<compile_context>
chip_gen: v7x
topology: tpu7x:2x2x1
jax: 0.10.0
libtpu: 0.0.40
codegen_flags: <defaults>
</compile_context>

<pallas_src>
import math
import functools

import numpy as np
import jax
import jax.numpy as jnp
from jax import lax
from jax.experimental import pallas as pl
from jax.experimental.pallas import tpu as pltpu


# --------------------------------------------------------------------------------------
# Kernel
# --------------------------------------------------------------------------------------
def kunet_decoder_kernel(*refs, stage_meta):
    """refs = (x_ref, w0,b0, w1,b1, ..., o_ref).

    stage_meta: tuple of (num_linears, expand, row_dim) per KernelWrapper stage.
    Each stage is an MLP (Linear -> tanh -> ... -> Linear); its (rows, expand*row_dim)
    output is re-stacked CHUNK-MAJOR into (expand*rows, row_dim) rows for the next
    stage.  The chunk-major restack is built from lane-slices (whole-vreg copies, no
    (8,128) relayout); the row permutation it introduces is undone by a pure-layout
    transpose in the wrapper.
    """
    x_ref = refs[0]
    o_ref = refs[-1]
    w_refs = refs[1:-1]

    h = x_ref[...]                       # (BT, in_size), f32
    k = 0
    for (n_lin, expand, row_dim) in stage_meta:
        for j in range(n_lin):
            w = w_refs[k][...]           # bf16 — single-pass MXU operand
            b = w_refs[k + 1][...]       # f32 bias
            k += 2
            # bf16 operands on the MXU, f32 accumulation; bias-add / tanh stay f32.
            h = jnp.dot(h.astype(jnp.bfloat16), w,
                        preferred_element_type=jnp.float32) + b
            if j + 1 < n_lin:
                h = jnp.tanh(h)
            # TODO(synk): nn.Dropout(p=0.01) after each hidden activation is identity
            # in eval mode; training-mode dropout is not implemented.
        if expand > 1:
            # Chunk-major restack: (rows, expand*row_dim) -> (expand*rows, row_dim).
            # Lane-slices of h are already whole (8,128) tiles, so this is just
            # sublane-offset stores (no XLU relayout, unlike h.reshape(...)).
            h = jnp.concatenate(
                [h[:, c * row_dim:(c + 1) * row_dim] for c in range(expand)], axis=0)

    o_ref[...] = h.astype(o_ref.dtype)


# --------------------------------------------------------------------------------------
# Config -> stage/MLP sizing (mirrors KUNetDecoder.__init__ + Linear.__init__)
# --------------------------------------------------------------------------------------
def build_decoder_spec(cfg):
    input_dim, input_len = cfg["input_dim"], cfg["input_len"]
    output_dim, output_len = cfg["output_dim"], cfg["output_len"]
    n_width, n_height = cfg["n_width"], cfg["n_height"]
    hid_r = list(reversed(cfg["hidden_dim_list"]))
    khl_r = list(reversed(cfg["kernel_hidden_layer_list"]))

    lag_list = [input_len]
    if not (len(n_width) == 1 and n_width[0] == 1):
        lag_list += list(n_width)
    if not (len(n_height) == 1 and n_height[0] == 1):
        lag_list += list(n_height)
    if (len(n_width) == 1 or n_width[0] == 1) and (len(n_height) == 1 or n_height[0] == 1):
        lag_list += list(n_height)

    # KernelWrapper stages: (input_dim, output_dim, output_len, kernel_hidden_layer)
    wrappers = [(input_dim, hid_r[0], lag_list[1], khl_r[0])]
    for i, l in enumerate(lag_list[2:], 1):
        wrappers.append((hid_r[i - 1], hid_r[i], l, khl_r[i]))
    wrappers.append((hid_r[-1], output_dim, output_len, khl_r[-1]))

    stages = []
    for (din, dout, olen, khl) in wrappers:
        in_size, out_size = 1 * din, olen * dout
        sizes = [in_size]
        if in_size >= out_size:                       # Linear "encoder" branch
            gap = int((in_size - out_size) / (khl + 1))
            sizes += [in_size - i * gap for i in range(1, khl + 1)]
        else:                                         # Linear "decoder" branch
            gap = int((out_size - in_size) / (khl + 1))
            sizes += [in_size + i * gap for i in range(1, khl + 1)]
        sizes.append(out_size)
        stages.append({"sizes": sizes, "expand": olen, "row_dim": dout})
    return stages


def make_params(key, stages):
    """Flat [W, b, W, b, ...] list; W stored as (in, out); nn.Linear-style init (f32)."""
    flat = []
    for st in stages:
        sizes = st["sizes"]
        for j in range(len(sizes) - 1):
            key, k1, k2 = jax.random.split(key, 3)
            bound = 1.0 / math.sqrt(sizes[j])
            flat.append(jax.random.uniform(k1, (sizes[j], sizes[j + 1]), jnp.float32,
                                           -bound, bound))
            flat.append(jax.random.uniform(k2, (1, sizes[j + 1]), jnp.float32,
                                           -bound, bound))
    return flat


# --------------------------------------------------------------------------------------
# Wrapper
# --------------------------------------------------------------------------------------
def _default_bt_cap():
    # v5e MXU is 4x128x128 (M=128 already fills it); v6e/v7x MXUs are 256-wide.
    try:
        kind = jax.devices()[0].device_kind.lower()
    except Exception:
        return 256
    if "v5 lite" in kind or "v5e" in kind or "v5litepod" in kind:
        return 128
    return 256


def _round8(n):
    return max(8, int(math.ceil(n / 8)) * 8)


def kunet_decoder_forward(x, flat_weights, cfg, stages, *, bt_cap=None):
    B = x.shape[0]
    in_size = stages[0]["sizes"][0]
    out_dim = stages[-1]["row_dim"]
    expands = [st["expand"] for st in stages]
    total_expand = int(np.prod(expands))

    x2 = x.reshape(B, in_size).astype(jnp.float32)

    if bt_cap is None:
        bt_cap = _default_bt_cap()

    # Batch tile: multiple of 8 sublanes.  Split mid-size batches into >=2 grid steps
    # so both TensorCores on v7x get work; tiny batches use one minimal tile.
    if B >= 2 * bt_cap:
        BT = bt_cap
    elif B >= 16:
        BT = min(bt_cap, _round8(math.ceil(B / 2)))
    else:
        BT = _round8(B)
    B_pad = int(math.ceil(B / BT)) * BT
    if B_pad != B:
        x2 = jnp.pad(x2, ((0, B_pad - B), (0, 0)))
    num_tiles = B_pad // BT
    grid = (num_tiles,)

    # Matmul weights in bf16 (MXU-native), biases stay f32.
    kern_args = []
    for idx, a in enumerate(flat_weights):
        if idx % 2 == 0:
            kern_args.append(a.astype(jnp.bfloat16))
        else:
            kern_args.append(a.astype(jnp.float32))

    stage_meta = tuple((len(st["sizes"]) - 1, st["expand"], st["row_dim"]) for st in stages)
    kernel = functools.partial(kunet_decoder_kernel, stage_meta=stage_meta)

    # ------------------------- cost estimate (advisory) -------------------------
    rows, flops, trans = 1, 0, 0
    for st in stages:
        n_lin = len(st["sizes"]) - 1
        for j in range(n_lin):
            flops += 2 * rows * st["sizes"][j] * st["sizes"][j + 1]
            if j + 1 < n_lin:
                trans += rows * st["sizes"][j + 1]
        rows *= st["expand"]
    weight_bytes = int(sum(int(np.prod(a.shape)) * np.dtype(a.dtype).itemsize
                           for a in kern_args))
    in_bytes = int(B_pad * in_size * 4)
    out_bytes = int(B_pad * total_expand * out_dim * 4)
    ce = pl.CostEstimate(flops=int(flops * B_pad),
                         transcendentals=int(trans * B_pad),
                         bytes_accessed=weight_bytes + in_bytes + out_bytes)

    # ------------------------- audited VMEM limit -------------------------------
    interm_bytes, r = 0, BT
    for st in stages:
        interm_bytes = max(interm_bytes, r * max(st["sizes"]) * (4 + 2))  # f32 + bf16 copy
        r *= st["expand"]
    footprint = (2 * BT * in_size * 4                       # input double buffer
                 + 2 * BT * total_expand * out_dim * 4      # output double buffer
                 + 2 * weight_bytes                         # resident weights (2 bufs)
                 + 4 * interm_bytes)                        # live intermediates (generous)
    vmem_limit = int(min(56 * 2**20, max(32 * 2**20, footprint + (4 << 20))))

    out = pl.pallas_call(
        kernel,
        out_shape=jax.ShapeDtypeStruct((B_pad * total_expand, out_dim), jnp.float32),
        grid=grid,
        in_specs=[pl.BlockSpec((BT, in_size), lambda i: (i, 0))]
                 + [pl.BlockSpec(a.shape, lambda i: (0, 0)) for a in kern_args],
        out_specs=pl.BlockSpec((BT * total_expand, out_dim), lambda i: (i, 0)),
        compiler_params=pltpu.CompilerParams(
            dimension_semantics=("parallel",),   # lets v7x shard the batch grid over TCs
            vmem_limit_bytes=vmem_limit,
        ),
        cost_estimate=ce,
    )(x2, *kern_args)

    # Undo the kernel's chunk-major row ordering (pure layout, done once in XLA):
    # per tile the rows are ordered (c_{m-1}, ..., c_1, c_0, b); original order is
    # (b, c_0, c_1, ..., c_{m-1}).
    m = len(expands)
    out = out.reshape((num_tiles,) + tuple(reversed(expands)) + (BT, out_dim))
    perm = (0, m + 1) + tuple(range(m, 0, -1)) + (m + 2,)
    out = jnp.transpose(out, perm).reshape(B_pad, total_expand, out_dim)
    out = out[:B]                                            # drop padded batch rows

    # KUNetDecoder tail: reshape -> transpose(1,3) -> transpose(2,4) -> reshape.
    nw = int(np.prod(cfg["n_width"]))
    nh = int(np.prod(cfg["n_height"]))
    y = out.reshape(B, nw, 1, nh, cfg["output_len"], cfg["output_dim"])
    y = jnp.swapaxes(y, 1, 3)
    y = jnp.swapaxes(y, 2, 4)
    return y.reshape(B, nh * cfg["output_len"], nw * cfg["output_dim"])


# --------------------------------------------------------------------------------------
# Pure-JAX reference (mirrors the PyTorch forward, eval mode, full f32)
# --------------------------------------------------------------------------------------
def reference_forward(x, flat_weights, cfg, stages):
    B = x.shape[0]
    h = x.reshape(-1, stages[0]["sizes"][0]).astype(jnp.float32)
    k = 0
    for st in stages:
        h = h.reshape(-1, st["sizes"][0])
        n_lin = len(st["sizes"]) - 1
        for j in range(n_lin):
            W, b = flat_weights[k], flat_weights[k + 1]
            k += 2
            h = jnp.dot(h, W, precision=lax.Precision.HIGHEST) + b
            if j + 1 < n_lin:
                h = jnp.tanh(h)
    nw = int(np.prod(cfg["n_width"]))
    nh = int(np.prod(cfg["n_height"]))
    y = h.reshape(B, nw, 1, nh, cfg["output_len"], cfg["output_dim"])
    y = jnp.swapaxes(y, 1, 3)
    y = jnp.swapaxes(y, 2, 4)
    return y.reshape(B, nh * cfg["output_len"], nw * cfg["output_dim"])


# --------------------------------------------------------------------------------------
if __name__ == "__main__":
    cfg = {
        "input_dim": 128, "input_len": 4,
        "n_width": [1], "n_height": [4, 4],
        "output_dim": 128, "output_len": 1,
        "hidden_dim_list": [128, 128, 128],
        "kernel_hidden_layer_list": [1, 1, 1],
    }

    key = jax.random.PRNGKey(0)
    kx, kw = jax.random.split(key)
    B = 2
    # KUNetDecoder consumes (batch, lag=1, d_model) per its docstring / reshape constraints.
    x = jax.random.normal(kx, (B, 1, cfg["input_dim"]), jnp.float32)

    stages = build_decoder_spec(cfg)
    weights = make_params(kw, stages)

    out = kunet_decoder_forward(x, weights, cfg, stages)
    out = jax.block_until_ready(out)

    ref = reference_forward(x, weights, cfg, stages)
    total_h = int(np.prod(cfg["n_height"])) * cfg["output_len"]
    total_w = int(np.prod(cfg["n_width"])) * cfg["output_dim"]
    assert out.shape == (B, total_h, total_w), out.shape
    np.testing.assert_allclose(np.asarray(out), np.asarray(ref), rtol=2e-2, atol=2e-2)

    print("KERNEL_OK")
</pallas_src>

<mosaic_0001>
module attributes {stable_mosaic.version = 11 : i64} {
  func.func @kunet_decoder_kernel(%arg0: i32, %arg1: memref<8x128xf32, #tpu.memory_space<vmem>>, %arg2: memref<128x320xbf16, #tpu.memory_space<vmem>>, %arg3: memref<1x320xf32, #tpu.memory_space<vmem>>, %arg4: memref<320x512xbf16, #tpu.memory_space<vmem>>, %arg5: memref<1x512xf32, #tpu.memory_space<vmem>>, %arg6: memref<128x320xbf16, #tpu.memory_space<vmem>>, %arg7: memref<1x320xf32, #tpu.memory_space<vmem>>, %arg8: memref<320x512xbf16, #tpu.memory_space<vmem>>, %arg9: memref<1x512xf32, #tpu.memory_space<vmem>>, %arg10: memref<128x128xbf16, #tpu.memory_space<vmem>>, %arg11: memref<1x128xf32, #tpu.memory_space<vmem>>, %arg12: memref<128x128xbf16, #tpu.memory_space<vmem>>, %arg13: memref<1x128xf32, #tpu.memory_space<vmem>>, %arg14: memref<128x128xf32, #tpu.memory_space<vmem>>) attributes {dimension_semantics = [#tpu.dimension_semantics<parallel>], iteration_bounds = array<i64: 1>, scalar_prefetch = 0 : i64, scratch_operands = 0 : i64, tpu.core_type = #tpu.core_type<tc>, window_params = [{transform_indices = @transform_0, window_bounds = array<i64: 8, 128>}, {pipeline_mode = #tpu.pipeline_mode<synchronous>, transform_indices = @transform_1, window_bounds = array<i64: 128, 320>}, {pipeline_mode = #tpu.pipeline_mode<synchronous>, transform_indices = @transform_2, window_bounds = array<i64: 1, 320>}, {pipeline_mode = #tpu.pipeline_mode<synchronous>, transform_indices = @transform_3, window_bounds = array<i64: 320, 512>}, {pipeline_mode = #tpu.pipeline_mode<synchronous>, transform_indices = @transform_4, window_bounds = array<i64: 1, 512>}, {pipeline_mode = #tpu.pipeline_mode<synchronous>, transform_indices = @transform_5, window_bounds = array<i64: 128, 320>}, {pipeline_mode = #tpu.pipeline_mode<synchronous>, transform_indices = @transform_6, window_bounds = array<i64: 1, 320>}, {pipeline_mode = #tpu.pipeline_mode<synchronous>, transform_indices = @transform_7, window_bounds = array<i64: 320, 512>}, {pipeline_mode = #tpu.pipeline_mode<synchronous>, transform_indices = @transform_8, window_bounds = array<i64: 1, 512>}, {pipeline_mode = #tpu.pipeline_mode<synchronous>, transform_indices = @transform_9, window_bounds = array<i64: 128, 128>}, {pipeline_mode = #tpu.pipeline_mode<synchronous>, transform_indices = @transform_10, window_bounds = array<i64: 1, 128>}, {pipeline_mode = #tpu.pipeline_mode<synchronous>, transform_indices = @transform_11, window_bounds = array<i64: 128, 128>}, {pipeline_mode = #tpu.pipeline_mode<synchronous>, transform_indices = @transform_12, window_bounds = array<i64: 1, 128>}, {transform_indices = @transform_13, window_bounds = array<i64: 128, 128>}]} {
    %c0 = arith.constant 0 : index
    %c0_0 = arith.constant 0 : index
    %0 = vector.load %arg1[%c0, %c0_0] : memref<8x128xf32, #tpu.memory_space<vmem>>, vector<8x128xf32>
    %c0_1 = arith.constant 0 : index
    %c0_2 = arith.constant 0 : index
    %1 = vector.load %arg2[%c0_1, %c0_2] : memref<128x320xbf16, #tpu.memory_space<vmem>>, vector<128x320xbf16>
    %c0_3 = arith.constant 0 : index
    %c0_4 = arith.constant 0 : index
    %2 = vector.load %arg3[%c0_3, %c0_4] : memref<1x320xf32, #tpu.memory_space<vmem>>, vector<1x320xf32>
    %3 = arith.truncf %0 : vector<8x128xf32> to vector<8x128xbf16>
    %cst = arith.constant dense<0.000000e+00> : vector<8x320xf32>
    %4 = tpu.matmul %3, %1, %cst {dimension_numbers = #tpu.dot_dimension_numbers<[1], [0], [0], [1], [0, 0, 1, 1], [], []>} : vector<8x128xbf16>, vector<128x320xbf16>, vector<8x320xf32> -> vector<8x320xf32>
    %5 = vector.broadcast %2 : vector<1x320xf32> to vector<8x320xf32>
    %6 = arith.addf %4, %5 : vector<8x320xf32>
    %7 = math.tanh %6 : vector<8x320xf32>
    %c0_5 = arith.constant 0 : index
    %c0_6 = arith.constant 0 : index
    %8 = vector.load %arg4[%c0_5, %c0_6] : memref<320x512xbf16, #tpu.memory_space<vmem>>, vector<320x512xbf16>
    %c0_7 = arith.constant 0 : index
    %c0_8 = arith.constant 0 : index
    %9 = vector.load %arg5[%c0_7, %c0_8] : memref<1x512xf32, #tpu.memory_space<vmem>>, vector<1x512xf32>
    %10 = arith.truncf %7 : vector<8x320xf32> to vector<8x320xbf16>
    %cst_9 = arith.constant dense<0.000000e+00> : vector<8x512xf32>
    %11 = tpu.matmul %10, %8, %cst_9 {dimension_numbers = #tpu.dot_dimension_numbers<[1], [0], [0], [1], [0, 0, 1, 1], [], []>} : vector<8x320xbf16>, vector<320x512xbf16>, vector<8x512xf32> -> vector<8x512xf32>
    %12 = vector.broadcast %9 : vector<1x512xf32> to vector<8x512xf32>
    %13 = arith.addf %11, %12 : vector<8x512xf32>
    %14 = vector.extract_strided_slice %13 {offsets = [0, 0], sizes = [8, 128], strides = [1, 1]} : vector<8x512xf32> to vector<8x128xf32>
    %15 = vector.extract_strided_slice %13 {offsets = [0, 128], sizes = [8, 128], strides = [1, 1]} : vector<8x512xf32> to vector<8x128xf32>
    %16 = vector.extract_strided_slice %13 {offsets = [0, 256], sizes = [8, 128], strides = [1, 1]} : vector<8x512xf32> to vector<8x128xf32>
    %17 = vector.extract_strided_slice %13 {offsets = [0, 384], sizes = [8, 128], strides = [1, 1]} : vector<8x512xf32> to vector<8x128xf32>
    %18 = tpu.concatenate %14, %15, %16, %17 in 0 : vector<8x128xf32>, vector<8x128xf32>, vector<8x128xf32>, vector<8x128xf32> -> vector<32x128xf32>
    %c0_10 = arith.constant 0 : index
    %c0_11 = arith.constant 0 : index
    %19 = vector.load %arg6[%c0_10, %c0_11] : memref<128x320xbf16, #tpu.memory_space<vmem>>, vector<128x320xbf16>
    %c0_12 = arith.constant 0 : index
    %c0_13 = arith.constant 0 : index
    %20 = vector.load %arg7[%c0_12, %c0_13] : memref<1x320xf32, #tpu.memory_space<vmem>>, vector<1x320xf32>
    %21 = arith.truncf %18 : vector<32x128xf32> to vector<32x128xbf16>
    %cst_14 = arith.constant dense<0.000000e+00> : vector<32x320xf32>
    %22 = tpu.matmul %21, %19, %cst_14 {dimension_numbers = #tpu.dot_dimension_numbers<[1], [0], [0], [1], [0, 0, 1, 1], [], []>} : vector<32x128xbf16>, vector<128x320xbf16>, vector<32x320xf32> -> vector<32x320xf32>
    %23 = vector.broadcast %20 : vector<1x320xf32> to vector<32x320xf32>
    %24 = arith.addf %22, %23 : vector<32x320xf32>
    %25 = math.tanh %24 : vector<32x320xf32>
    %c0_15 = arith.constant 0 : index
    %c0_16 = arith.constant 0 : index
    %26 = vector.load %arg8[%c0_15, %c0_16] : memref<320x512xbf16, #tpu.memory_space<vmem>>, vector<320x512xbf16>
    %c0_17 = arith.constant 0 : index
    %c0_18 = arith.constant 0 : index
    %27 = vector.load %arg9[%c0_17, %c0_18] : memref<1x512xf32, #tpu.memory_space<vmem>>, vector<1x512xf32>
    %28 = arith.truncf %25 : vector<32x320xf32> to vector<32x320xbf16>
    %cst_19 = arith.constant dense<0.000000e+00> : vector<32x512xf32>
    %29 = tpu.matmul %28, %26, %cst_19 {dimension_numbers = #tpu.dot_dimension_numbers<[1], [0], [0], [1], [0, 0, 1, 1], [], []>} : vector<32x320xbf16>, vector<320x512xbf16>, vector<32x512xf32> -> vector<32x512xf32>
    %30 = vector.broadcast %27 : vector<1x512xf32> to vector<32x512xf32>
    %31 = arith.addf %29, %30 : vector<32x512xf32>
    %32 = vector.extract_strided_slice %31 {offsets = [0, 0], sizes = [32, 128], strides = [1, 1]} : vector<32x512xf32> to vector<32x128xf32>
    %33 = vector.extract_strided_slice %31 {offsets = [0, 128], sizes = [32, 128], strides = [1, 1]} : vector<32x512xf32> to vector<32x128xf32>
    %34 = vector.extract_strided_slice %31 {offsets = [0, 256], sizes = [32, 128], strides = [1, 1]} : vector<32x512xf32> to vector<32x128xf32>
    %35 = vector.extract_strided_slice %31 {offsets = [0, 384], sizes = [32, 128], strides = [1, 1]} : vector<32x512xf32> to vector<32x128xf32>
    %36 = tpu.concatenate %32, %33, %34, %35 in 0 : vector<32x128xf32>, vector<32x128xf32>, vector<32x128xf32>, vector<32x128xf32> -> vector<128x128xf32>
    %c0_20 = arith.constant 0 : index
    %c0_21 = arith.constant 0 : index
    %37 = vector.load %arg10[%c0_20, %c0_21] : memref<128x128xbf16, #tpu.memory_space<vmem>>, vector<128x128xbf16>
    %c0_22 = arith.constant 0 : index
    %c0_23 = arith.constant 0 : index
    %38 = vector.load %arg11[%c0_22, %c0_23] : memref<1x128xf32, #tpu.memory_space<vmem>>, vector<1x128xf32>
    %39 = arith.truncf %36 : vector<128x128xf32> to vector<128x128xbf16>
    %cst_24 = arith.constant dense<0.000000e+00> : vector<128x128xf32>
    %40 = tpu.matmul %39, %37, %cst_24 {dimension_numbers = #tpu.dot_dimension_numbers<[1], [0], [0], [1], [0, 0, 1, 1], [], []>} : vector<128x128xbf16>, vector<128x128xbf16>, vector<128x128xf32> -> vector<128x128xf32>
    %41 = vector.broadcast %38 : vector<1x128xf32> to vector<128x128xf32>
    %42 = arith.addf %40, %41 : vector<128x128xf32>
    %43 = math.tanh %42 : vector<128x128xf32>
    %c0_25 = arith.constant 0 : index
    %c0_26 = arith.constant 0 : index
    %44 = vector.load %arg12[%c0_25, %c0_26] : memref<128x128xbf16, #tpu.memory_space<vmem>>, vector<128x128xbf16>
    %c0_27 = arith.constant 0 : index
    %c0_28 = arith.constant 0 : index
    %45 = vector.load %arg13[%c0_27, %c0_28] : memref<1x128xf32, #tpu.memory_space<vmem>>, vector<1x128xf32>
    %46 = arith.truncf %43 : vector<128x128xf32> to vector<128x128xbf16>
    %cst_29 = arith.constant dense<0.000000e+00> : vector<128x128xf32>
    %47 = tpu.matmul %46, %44, %cst_29 {dimension_numbers = #tpu.dot_dimension_numbers<[1], [0], [0], [1], [0, 0, 1, 1], [], []>} : vector<128x128xbf16>, vector<128x128xbf16>, vector<128x128xf32> -> vector<128x128xf32>
    %48 = vector.broadcast %45 : vector<1x128xf32> to vector<128x128xf32>
    %49 = arith.addf %47, %48 : vector<128x128xf32>
    %c0_30 = arith.constant 0 : index
    %c0_31 = arith.constant 0 : index
    %50 = vector.load %arg14[%c0_30, %c0_31] : memref<128x128xf32, #tpu.memory_space<vmem>>, vector<128x128xf32>
    tpu.vector_store %arg14[%c0_30, %c0_31], %49 {strides = array<i32>} : memref<128x128xf32, #tpu.memory_space<vmem>>, vector<128x128xf32>,
    return
  }
  func.func @transform_0(%arg0: i32) -> (i32, i32) {
    %c0_i32 = arith.constant 0 : i32
    %c0_i32_0 = arith.constant 0 : i32
    return %arg0, %c0_i32 : i32, i32
  }
  func.func @transform_1(%arg0: i32) -> (i32, i32) {
    %c0_i32 = arith.constant 0 : i32
    %c0_i32_0 = arith.constant 0 : i32
    %c0_i32_1 = arith.constant 0 : i32
    return %c0_i32, %c0_i32_0 : i32, i32
  }
  func.func @transform_2(%arg0: i32) -> (i32, i32) {
    %c0_i32 = arith.constant 0 : i32
    %c0_i32_0 = arith.constant 0 : i32
    %c0_i32_1 = arith.constant 0 : i32
    return %c0_i32, %c0_i32_0 : i32, i32
  }
  func.func @transform_3(%arg0: i32) -> (i32, i32) {
    %c0_i32 = arith.constant 0 : i32
    %c0_i32_0 = arith.constant 0 : i32
    %c0_i32_1 = arith.constant 0 : i32
    return %c0_i32, %c0_i32_0 : i32, i32
  }
  func.func @transform_4(%arg0: i32) -> (i32, i32) {
    %c0_i32 = arith.constant 0 : i32
    %c0_i32_0 = arith.constant 0 : i32
    %c0_i32_1 = arith.constant 0 : i32
    return %c0_i32, %c0_i32_0 : i32, i32
  }
  func.func @transform_5(%arg0: i32) -> (i32, i32) {
    %c0_i32 = arith.constant 0 : i32
    %c0_i32_0 = arith.constant 0 : i32
    %c0_i32_1 = arith.constant 0 : i32
    return %c0_i32, %c0_i32_0 : i32, i32
  }
  func.func @transform_6(%arg0: i32) -> (i32, i32) {
    %c0_i32 = arith.constant 0 : i32
    %c0_i32_0 = arith.constant 0 : i32
    %c0_i32_1 = arith.constant 0 : i32
    return %c0_i32, %c0_i32_0 : i32, i32
  }
  func.func @transform_7(%arg0: i32) -> (i32, i32) {
    %c0_i32 = arith.constant 0 : i32
    %c0_i32_0 = arith.constant 0 : i32
    %c0_i32_1 = arith.constant 0 : i32
    return %c0_i32, %c0_i32_0 : i32, i32
  }
  func.func @transform_8(%arg0: i32) -> (i32, i32) {
    %c0_i32 = arith.constant 0 : i32
    %c0_i32_0 = arith.constant 0 : i32
    %c0_i32_1 = arith.constant 0 : i32
    return %c0_i32, %c0_i32_0 : i32, i32
  }
  func.func @transform_9(%arg0: i32) -> (i32, i32) {
    %c0_i32 = arith.constant 0 : i32
    %c0_i32_0 = arith.constant 0 : i32
    %c0_i32_1 = arith.constant 0 : i32
    return %c0_i32, %c0_i32_0 : i32, i32
  }
  func.func @transform_10(%arg0: i32) -> (i32, i32) {
    %c0_i32 = arith.constant 0 : i32
    %c0_i32_0 = arith.constant 0 : i32
    %c0_i32_1 = arith.constant 0 : i32
    return %c0_i32, %c0_i32_0 : i32, i32
  }
  func.func @transform_11(%arg0: i32) -> (i32, i32) {
    %c0_i32 = arith.constant 0 : i32
    %c0_i32_0 = arith.constant 0 : i32
    %c0_i32_1 = arith.constant 0 : i32
    return %c0_i32, %c0_i32_0 : i32, i32
  }
  func.func @transform_12(%arg0: i32) -> (i32, i32) {
    %c0_i32 = arith.constant 0 : i32
    %c0_i32_0 = arith.constant 0 : i32
    %c0_i32_1 = arith.constant 0 : i32
    return %c0_i32, %c0_i32_0 : i32, i32
  }
  func.func @transform_13(%arg0: i32) -> (i32, i32) {
    %c0_i32 = arith.constant 0 : i32
    %c0_i32_0 = arith.constant 0 : i32
    return %arg0, %c0_i32 : i32, i32
  }
}

</mosaic_0001>

<bundles_post_ra>
// kernel: tpu_custom_call.1
= control target key start
LH: loop header
LB: loop body
LE: loop exit
PB: predicated region body
PF: predicated region fallthrough
CT: control target
= control target key end

     0   :  { %18 = vsyncpa [#allocation3], 0  ;;  %s3927_s0 = inlined_call_operand.vmem [shape: f32[8,128], index: 0, kind: input, shape index: {}]   ;;  %s3928_s1 = inlined_call_operand.vmem [shape: bf16[128,320], index: 1, kind: input, shape index: {}]   ;;  %s3929_s2 = inlined_call_operand.vmem [shape: f32[1,320], index: 2, kind: input, shape index: {}]   ;;  %s3930_s3 = inlined_call_operand.vmem [shape: bf16[320,512], index: 3, kind: input, shape index: {}]   ;;  %s3931_s4 = inlined_call_operand.vmem [shape: f32[1,512], index: 4, kind: input, shape index: {}]   ;;  %s3932_s5 = inlined_call_operand.vmem [shape: bf16[128,320], index: 5, kind: input, shape index: {}]   ;;  %s3933_s6 = inlined_call_operand.vmem [shape: f32[1,320], index: 6, kind: input, shape index: {}]   ;;  %s3934_s7 = inlined_call_operand.hbm [shape: bf16[320,512], index: 7, kind: input, shape index: {}]   ;;  %s3935_s8 = inlined_call_operand.vmem [shape: f32[1,512], index: 8, kind: input, shape index: {}]   ;;  %s3936_s9 = inlined_call_operand.vmem [shape: bf16[128,128], index: 9, kind: input, shape index: {}]   ;;  %s3937_s10 = inlined_call_operand.vmem [shape: f32[1,128], index: 10, kind: input, shape index: {}]   ;;  %s3938_s11 = inlined_call_operand.hbm [shape: bf16[128,128], index: 11, kind: input, shape index: {}]   ;;  %s3939_s12 = inlined_call_operand.vmem [shape: f32[1,128], index: 12, kind: input, shape index: {}]   ;;  %s3940_s13 = inlined_call_operand.hbm [shape: f32[128,128], index: 13, kind: output, shape index: {}]  }
   0x1   :  { %19 = vsyncpa [#allocation6], 0 }
   0x2   :  { %20 = vsyncpa [#allocation4], 0  ;;  %s3328_s25 = smov [#allocation2]   ;;  %s3256_s29 = scalar_lea.hbm %s3934_s7, 10240 }
   0x3   :  { %s40_s26 = sshll.u32 %s3328_s25, 4  ;;  %p3257_p0 = scmp.ne.s32.totalorder %s3934_s7, %s3256_s29  ;;  %s41_s26 = int_to_ptr.vmem [resolvable:$true] %s40_s26 }
   0x4   :  { %p3260_p1 = scmp.lt.u32.totalorder %s3256_s29, %s3934_s7 }
   0x6   :  { %p3262_p2 = pnand %p3260_p1, %p3257_p0 }
   0x8   :  { %3265 = shalt.err (!%p3262_p2)
}
   0x9   :  { %s3266_s17 = scalar_lea.vmem %s41_s26, 10240  ;;  %p3271_p4 = scmp.lt.s32.totalorder %s41_s26, %s41_s26 }
   0xa   :  { %p3267_p3 = scmp.ne.s32.totalorder %s41_s26, %s3266_s17  ;;  %p3272_p5 = scmp.lt.s32.totalorder %s3266_s17, %s3266_s17 }
   0xc   :  { %p3273_p6 = por %p3272_p5, %p3271_p4 }
   0xe   :  { %p3274_p7 = pnand %p3273_p6, %p3267_p3 }
  0x10   :  { %3277 = shalt.err (!%p3274_p7)
}
  0x11   :  { %s3329_s18 = smov 256   ;;  %s3330_s19 = smov 16  }
  0x12   :  { %46 = dma.hbm_to_vmem [thread:$0]  %s3934_s7, 10240, %s41_s26, [#allocation3], %s3329_s18, %s3329_s18, %s3330_s19  }
  0x13   :  { %s3331_s22 = smov [#allocation5]   ;;  %s3278_s27 = scalar_lea.hbm %s3938_s11, 1024 }
  0x14   :  { %s58_s23 = sshll.u32 %s3331_s22, 4  ;;  %p3279_p8 = scmp.ne.s32.totalorder %s3938_s11, %s3278_s27  ;;  %s59_s23 = int_to_ptr.vmem [resolvable:$true] %s58_s23 }
  0x15   :  { %p3282_p9 = scmp.lt.u32.totalorder %s3278_s27, %s3938_s11 }
  0x17   :  { %p3284_p10 = pnand %p3282_p9, %p3279_p8 }
  0x19   :  { %3287 = shalt.err (!%p3284_p10)
}
  0x1a   :  { %s3288_s15 = scalar_lea.vmem %s59_s23, 1024  ;;  %p3293_p12 = scmp.lt.s32.totalorder %s59_s23, %s59_s23 }
  0x1b   :  { %p3289_p11 = scmp.ne.s32.totalorder %s59_s23, %s3288_s15  ;;  %p3294_p13 = scmp.lt.s32.totalorder %s3288_s15, %s3288_s15 }
  0x1d   :  { %p3295_p0 = por %p3294_p13, %p3293_p12 }
  0x1f   :  { %p3296_p1 = pnand %p3295_p0, %p3289_p11 }
  0x21   :  { %3299 = shalt.err (!%p3296_p1)
}
  0x22   :  { %s3332_s7 = smov 64   ;;  %s3333_s26 = smov 4  }
  0x23   :  { %64 = dma.hbm_to_vmem [thread:$0]  %s3938_s11, 1024, %s59_s23, [#allocation6], %s3332_s7, %s3332_s7, %s3333_s26  }
  0x24   :  { %3322 = dma.done.wait [#allocation3], 10240  }
  0x25   :  { %3323 = vsyncadd [#allocation3], 4294957056 }
  0x26   :  { %3324 = dma.done.wait [#allocation6], 1024  }
  0x27   :  { %3325 = vsyncadd [#allocation6], 4294966272  ;;  %v3334_v0 = vmov 0.0   ;;  %v3335_v1 = vmov 0   ;;  %vm3336_vm0 = vmmov 0   ;;  %v74_v24 = vld [vmem:[%s3927_s0] sm:$0xff] }
  0x28   :  { %2714 = vmatprep.subr.bf16.mxu1 %v3334_v0  ;;  %285 = vmatprep.mubr.bf16.mxu0 %v3335_v1  ;;  %v2874_v2 = vld [vmem:[%s3928_s1 + $0x4] ss:$12 sps:$4 sm:$0xff]   ;;  %v2876_v3 = vld [vmem:[%s3928_s1] ss:$12 sps:$4 sm:$0xff]   ;;  %v2877_v4 = vld [vmem:[%s3928_s1 + $0x1c] ss:$12 sps:$4 sm:$0xff]   ;;  %v108_v27 = vpack.c.bf16 %v74_v24, %v74_v24 }
  0x29   :  { %2730 = vmatprep.mubr.msk.bf16.mxu1 %vm3336_vm0, %v3334_v0  ;;  %253 = vmatprep.subr.bf16.mxu0 %v2874_v2  ;;  %v2879_v5 = vld [vmem:[%s3928_s1 + $0x18] ss:$12 sps:$4 sm:$0xff]   ;;  %v2880_v6 = vld [vmem:[%s3928_s1 + $0x34] ss:$12 sps:$4 sm:$0xff]   ;;  %v2882_v8 = vld [vmem:[%s3928_s1 + $0x30] ss:$12 sps:$4 sm:$0xff]  }
  0x2a   :  { %254 = vmatpush1.bf16.msra.mxu0 %v2876_v3  ;;  %v2886_v7 = vld [vmem:[%s3928_s1 + $0x8] ss:$12 sps:$4 sm:$0xff]   ;;  %v2883_v9 = vld [vmem:[%s3928_s1 + $0x4c] ss:$12 sps:$4 sm:$0xff]   ;;  %v2887_v12 = vld [vmem:[%s3928_s1 + $0x64] ss:$12 sps:$4 sm:$0xff]  }
  0x2b   :  { %255 = vmatprep.subr.bf16.mxu0 %v2877_v4  ;;  %2715 = vmatpush3.bf16.msra.mxu1 %v2886_v7  ;;  %v2890_v10 = vld [vmem:[%s3928_s1 + $0x20] ss:$12 sps:$4 sm:$0xff]   ;;  %v2885_v11 = vld [vmem:[%s3928_s1 + $0x48] ss:$12 sps:$4 sm:$0xff]   ;;  %v2894_v13 = vld [vmem:[%s3928_s1 + $0x38] ss:$12 sps:$4 sm:$0xff]  }
  0x2c   :  { %2716 = vmatprep.subr.bf16.mxu1 %v3334_v0  ;;  %v2889_v14 = vld [vmem:[%s3928_s1 + $0x60] ss:$12 sps:$4 sm:$0xff]   ;;  %v2891_v15 = vld [vmem:[%s3928_s1 + $0x7c] ss:$12 sps:$4 sm:$0xff]   ;;  %v2893_v17 = vld [vmem:[%s3928_s1 + $0x78] ss:$12 sps:$4 sm:$0xff]  }
  0x2d   :  { %v2898_v16 = vld [vmem:[%s3928_s1 + $0x50] ss:$12 sps:$4 sm:$0xff]   ;;  %v2895_v18 = vld [vmem:[%s3928_s1 + $0x94] ss:$12 sps:$4 sm:$0xff]   ;;  %v2899_v21 = vld [vmem:[%s3928_s1 + $0xac] ss:$12 sps:$4 sm:$0xff]  }
  0x2e   :  { %256 = vmatpush1.bf16.msra.mxu0 %v2879_v5  ;;  %v2902_v19 = vld [vmem:[%s3928_s1 + $0x68] ss:$12 sps:$4 sm:$0xff]   ;;  %v2897_v20 = vld [vmem:[%s3928_s1 + $0x90] ss:$12 sps:$4 sm:$0xff]   ;;  %v2903_v22 = vld [vmem:[%s3928_s1 + $0x80] ss:$12 sps:$4 sm:$0xff]  }
  0x2f   :  { %257 = vmatprep.subr.bf16.mxu0 %v2880_v6  ;;  %2717 = vmatpush3.bf16.msra.mxu1 %v2890_v10  ;;  %v2901_v23 = vld [vmem:[%s3928_s1 + $0xa8] ss:$12 sps:$4 sm:$0xff]   ;;  %v2904_v25 = vld [vmem:[%s3928_s1 + $0x98] ss:$12 sps:$4 sm:$0xff]   ;;  %v2905_v28 = vld [vmem:[%s3928_s1 + $0xb0] ss:$12 sps:$4 sm:$0xff]  }
  0x30   :  { %2718 = vmatprep.subr.bf16.mxu1 %v3334_v0  ;;  %v2908_v26 = vld [vmem:[%s3930_s3 + $0x4] ss:$16 sps:$4 sm:$0xff]   ;;  %v2906_v29 = vld [vmem:[%s3930_s3] ss:$16 sps:$4 sm:$0xff]   ;;  %v2911_v31 = vld [vmem:[%s3930_s3 + $0xc] ss:$16 sps:$4 sm:$0xff]  }
  0x31   :  { %v2914_v30 = vld [vmem:[%s3930_s3 + $0x24] ss:$16 sps:$4 sm:$0xff]   ;;  %v2909_v32 = vld [vmem:[%s3930_s3 + $0x8] ss:$16 sps:$4 sm:$0xff]   ;;  %v2912_v33 = vld [vmem:[%s3930_s3 + $0x20] ss:$16 sps:$4 sm:$0xff]  }
  0x32   :  { %258 = vmatpush1.bf16.msra.mxu0 %v2882_v8  ;;  %v2920_v34 = vld [vmem:[%s3930_s3 + $0x44] ss:$16 sps:$4 sm:$0xff]   ;;  %v2917_v35 = vld [vmem:[%s3930_s3 + $0x2c] ss:$16 sps:$4 sm:$0xff]   ;;  %v2915_v36 = vld [vmem:[%s3930_s3 + $0x28] ss:$16 sps:$4 sm:$0xff]  }
  0x33   :  { %259 = vmatprep.subr.bf16.mxu0 %v2883_v9  ;;  %2719 = vmatpush3.bf16.msra.mxu1 %v2894_v13  ;;  %v2918_v37 = vld [vmem:[%s3930_s3 + $0x40] ss:$16 sps:$4 sm:$0xff]   ;;  %v2926_v38 = vld [vmem:[%s3930_s3 + $0x64] ss:$16 sps:$4 sm:$0xff]   ;;  %v2923_v39 = vld [vmem:[%s3930_s3 + $0x4c] ss:$16 sps:$4 sm:$0xff]  }
  0x34   :  { %2720 = vmatprep.subr.bf16.mxu1 %v3334_v0  ;;  %v2921_v40 = vld [vmem:[%s3930_s3 + $0x48] ss:$16 sps:$4 sm:$0xff]   ;;  %v2924_v41 = vld [vmem:[%s3930_s3 + $0x60] ss:$16 sps:$4 sm:$0xff]   ;;  %v2932_v42 = vld [vmem:[%s3930_s3 + $0x84] ss:$16 sps:$4 sm:$0xff]  }
  0x35   :  { %v2929_v43 = vld [vmem:[%s3930_s3 + $0x6c] ss:$16 sps:$4 sm:$0xff]   ;;  %v2927_v44 = vld [vmem:[%s3930_s3 + $0x68] ss:$16 sps:$4 sm:$0xff]   ;;  %v2930_v45 = vld [vmem:[%s3930_s3 + $0x80] ss:$16 sps:$4 sm:$0xff]  }
  0x36   :  { %260 = vmatpush1.bf16.msra.mxu0 %v2885_v11  ;;  %v2938_v46 = vld [vmem:[%s3930_s3 + $0xa4] ss:$16 sps:$4 sm:$0xff]   ;;  %v2935_v47 = vld [vmem:[%s3930_s3 + $0x8c] ss:$16 sps:$4 sm:$0xff]   ;;  %v2933_v48 = vld [vmem:[%s3930_s3 + $0x88] ss:$16 sps:$4 sm:$0xff]  }
  0x37   :  { %261 = vmatprep.subr.bf16.mxu0 %v2887_v12  ;;  %2721 = vmatpush3.bf16.msra.mxu1 %v2898_v16  ;;  %v2936_v49 = vld [vmem:[%s3930_s3 + $0xa0] ss:$16 sps:$4 sm:$0xff]   ;;  %v2941_v50 = vld [vmem:[%s3930_s3 + $0xac] ss:$16 sps:$4 sm:$0xff]   ;;  %v2944_v51 = vld [vmem:[%s3930_s3 + $0xc4] ss:$16 sps:$4 sm:$0xff]  }
  0x38   :  { %2722 = vmatprep.subr.bf16.mxu1 %v3334_v0  ;;  %v2942_v52 = vld [vmem:[%s3930_s3 + $0xc0] ss:$16 sps:$4 sm:$0xff]   ;;  %v2939_v53 = vld [vmem:[%s3930_s3 + $0xa8] ss:$16 sps:$4 sm:$0xff]   ;;  %v2950_v54 = vld [vmem:[%s3930_s3 + $0xe4] ss:$16 sps:$4 sm:$0xff]  }
  0x39   :  { %v2947_v55 = vld [vmem:[%s3930_s3 + $0xcc] ss:$16 sps:$4 sm:$0xff]   ;;  %v2948_v56 = vld [vmem:[%s3930_s3 + $0xe0] ss:$16 sps:$4 sm:$0xff]   ;;  %v2945_v57 = vld [vmem:[%s3930_s3 + $0xc8] ss:$16 sps:$4 sm:$0xff]  }
  0x3a   :  { %262 = vmatpush1.bf16.msra.mxu0 %v2889_v14  ;;  %v2956_v58 = vld [vmem:[%s3930_s3 + $0x104] ss:$16 sps:$4 sm:$0xff]   ;;  %v2953_v59 = vld [vmem:[%s3930_s3 + $0xec] ss:$16 sps:$4 sm:$0xff]   ;;  %v2954_v60 = vld [vmem:[%s3930_s3 + $0x100] ss:$16 sps:$4 sm:$0xff]  }
  0x3b   :  { %263 = vmatprep.subr.bf16.mxu0 %v2891_v15  ;;  %2723 = vmatpush3.bf16.msra.mxu1 %v2902_v19  ;;  %v2951_v61 = vld [vmem:[%s3930_s3 + $0xe8] ss:$16 sps:$4 sm:$0xff]   ;;  %v2962_v62 = vld [vmem:[%s3930_s3 + $0x124] ss:$16 sps:$4 sm:$0xff]   ;;  %v2959_v63 = vld [vmem:[%s3930_s3 + $0x10c] ss:$16 sps:$4 sm:$0xff]  }
  0x3c   :  { %2724 = vmatprep.subr.bf16.mxu1 %v3334_v0  ;;  %v2957_v2 = vld [vmem:[%s3930_s3 + $0x108] ss:$16 sps:$4 sm:$0xff]   ;;  %v2968_v3 = vld [vmem:[%s3930_s3 + $0x144] ss:$16 sps:$4 sm:$0xff]   ;;  %v2965_v4 = vld [vmem:[%s3930_s3 + $0x12c] ss:$16 sps:$4 sm:$0xff]  }
  0x3d   :  { %v2966_v5 = vld [vmem:[%s3930_s3 + $0x140] ss:$16 sps:$4 sm:$0xff]   ;;  %v2963_v6 = vld [vmem:[%s3930_s3 + $0x128] ss:$16 sps:$4 sm:$0xff]   ;;  %v2974_v7 = vld [vmem:[%s3930_s3 + $0x164] ss:$16 sps:$4 sm:$0xff]  }
  0x3e   :  { %264 = vmatpush1.bf16.msra.mxu0 %v2893_v17  ;;  %v2971_v8 = vld [vmem:[%s3930_s3 + $0x14c] ss:$16 sps:$4 sm:$0xff]   ;;  %v2972_v9 = vld [vmem:[%s3930_s3 + $0x160] ss:$16 sps:$4 sm:$0xff]   ;;  %v2969_v10 = vld [vmem:[%s3930_s3 + $0x148] ss:$16 sps:$4 sm:$0xff]  }
  0x3f   :  { %265 = vmatprep.subr.bf16.mxu0 %v2895_v18  ;;  %2725 = vmatpush3.bf16.msra.mxu1 %v2903_v22  ;;  %v2977_v11 = vld [vmem:[%s3930_s3 + $0x16c] ss:$16 sps:$4 sm:$0xff]   ;;  %v2975_v12 = vld [vmem:[%s3930_s3 + $0x168] ss:$16 sps:$4 sm:$0xff]   ;;  %v2980_v13 = vld [vmem:[%s3930_s3 + $0x184] ss:$16 sps:$4 sm:$0xff]  }
  0x40   :  { %2726 = vmatprep.subr.bf16.mxu1 %v3334_v0  ;;  %v2983_v14 = vld [vmem:[%s3930_s3 + $0x18c] ss:$16 sps:$4 sm:$0xff]   ;;  %v2978_v15 = vld [vmem:[%s3930_s3 + $0x180] ss:$16 sps:$4 sm:$0xff]   ;;  %v2981_v16 = vld [vmem:[%s3930_s3 + $0x188] ss:$16 sps:$4 sm:$0xff]  }
  0x41   :  { %v2986_v17 = vld [vmem:[%s3930_s3 + $0x1a4] ss:$16 sps:$4 sm:$0xff]   ;;  %v2989_v18 = vld [vmem:[%s3930_s3 + $0x1ac] ss:$16 sps:$4 sm:$0xff]   ;;  %v2984_v19 = vld [vmem:[%s3930_s3 + $0x1a0] ss:$16 sps:$4 sm:$0xff]  }
  0x42   :  { %266 = vmatpush1.bf16.msra.mxu0 %v2897_v20  ;;  %v2987_v20 = vld [vmem:[%s3930_s3 + $0x1a8] ss:$16 sps:$4 sm:$0xff]   ;;  %v2995_v22 = vld [vmem:[%s3930_s3 + $0x1cc] ss:$16 sps:$4 sm:$0xff]   ;;  %vm842_vm1 = vcmask 523264  }
  0x43   :  { %267 = vmatprep.subr.bf16.mxu0 %v2899_v21  ;;  %2727 = vmatpush3.bf16.msra.mxu1 %v2904_v25  ;;  %v2992_v21 = vld [vmem:[%s3930_s3 + $0x1c4] ss:$16 sps:$4 sm:$0xff]   ;;  %v2993_v24 = vld [vmem:[%s3930_s3 + $0x1c8] ss:$16 sps:$4 sm:$0xff]  }
  0x44   :  { %2728 = vmatprep.subr.bf16.mxu1 %v3334_v0  ;;  %v2960_v0 = vld [vmem:[%s3930_s3 + $0x120] ss:$16 sps:$4 sm:$0xff]   ;;  %v2998_v25 = vld [vmem:[%s3930_s3 + $0x1e4] ss:$16 sps:$4 sm:$0xff]  }
  0x46   :  { %268 = vmatpush1.bf16.msra.mxu0 %v2901_v23  ;;  %v2990_v23 = vld [vmem:[%s3930_s3 + $0x1c0] ss:$16 sps:$4 sm:$0xff]  }
  0x47   :  { %846 = vmatprep.subr.bf16.mxu0 %v2908_v26  ;;  %2729 = vmatpush3.bf16.msra.mxu1 %v2905_v28  ;;  %v3001_v26 = vld [vmem:[%s3930_s3 + $0x1ec] ss:$16 sps:$4 sm:$0xff]   ;;  %v2999_v28 = vld [vmem:[%s3930_s3 + $0x1e8] ss:$16 sps:$4 sm:$0xff]  }
  0x48   :  { %928 = vmatprep.subr.bf16.mxu1 %v2911_v31  ;;  %v110_v31 = vlaneseq }
  0x49   :  { %286 = vmatmul.mubr.bf16.vlgmr.msra.gmra.mrb[0].mxu0 %v108_v27 }
  0x4a   :  { %847 = vmatpush1.bf16.msra.mxu0 %v2906_v29  ;;  %2731 = vmatmul.mubr.bf16.vlgmr.msra.gmra.mrb[0].mxu1 %v108_v27  ;;  %v2996_v27 = vld [vmem:[%s3930_s3 + $0x1e0] ss:$16 sps:$4 sm:$0xff]   ;;  %v3004_v29 = vld [vmem:[%s3930_s3 + $0x204] ss:$16 sps:$4 sm:$0xff]  }
  0x4b   :  { %848 = vmatprep.subr.bf16.mxu0 %v2914_v30  ;;  %929 = vmatpush1.bf16.msra.mxu1 %v2909_v32  ;;  %v3007_v30 = vld [vmem:[%s3930_s3 + $0x20c] ss:$16 sps:$4 sm:$0xff]   ;;  %v3717_v32 = vshrl.u32 %v110_v31, 7 }
  0x4c   :  { %930 = vmatprep.subr.bf16.mxu1 %v2917_v35  ;;  %v3057_v31 = vld [vmem:[%s3932_s5 + $0xb0] ss:$12 sps:$4 sm:$0xff]  }
  0x4d   :  { %v3726_v35 = vsub.s32 1, %v3717_v32 }
  0x4e   :  { %849 = vmatpush1.bf16.msra.mxu0 %v2912_v33  ;;  %v3720_v33 = vsub.s32 0, %v3717_v32 }
  0x4f   :  { %850 = vmatprep.subr.bf16.mxu0 %v2920_v34  ;;  %931 = vmatpush1.bf16.msra.mxu1 %v2915_v36  ;;  %v107_v34 = vld [vmem:[%s3929_s2] sm:$0x7] }
  0x50   :  { %932 = vmatprep.subr.bf16.mxu1 %v2923_v39  ;;  %v113_v36 = vrot.slane %v107_v34, %v3720_v33 }
  0x52   :  { %851 = vmatpush1.bf16.msra.mxu0 %v2918_v37  ;;  %v117_v37 = vrot.slane %v107_v34, %v3726_v35 }
  0x53   :  { %852 = vmatprep.subr.bf16.mxu0 %v2926_v38  ;;  %933 = vmatpush1.bf16.msra.mxu1 %v2921_v40 }
  0x54   :  { %934 = vmatprep.subr.bf16.mxu1 %v2929_v43 }
  0x56   :  { %853 = vmatpush1.bf16.msra.mxu0 %v2924_v41 }
  0x57   :  { %854 = vmatprep.subr.bf16.mxu0 %v2932_v42  ;;  %935 = vmatpush1.bf16.msra.mxu1 %v2927_v44  ;;  %v3731_v44 = vsub.s32 2, %v3717_v32 }
  0x58   :  { %936 = vmatprep.subr.bf16.mxu1 %v2935_v47 }
  0x5a   :  { %855 = vmatpush1.bf16.msra.mxu0 %v2930_v45 }
  0x5b   :  { %856 = vmatprep.subr.bf16.mxu0 %v2938_v46  ;;  %937 = vmatpush1.bf16.msra.mxu1 %v2933_v48 }
  0x5c   :  { %938 = vmatprep.subr.bf16.mxu1 %v2941_v50 }
  0x5e   :  { %857 = vmatpush1.bf16.msra.mxu0 %v2936_v49  ;;  %v121_v49 = vrot.slane %v107_v34, %v3731_v44  ;;  %v3060_v34 = vld [vmem:[#allocation2 + $0x4] ss:$16 sps:$4 sm:$0xff]  }
  0x5f   :  { %858 = vmatprep.subr.bf16.mxu0 %v2944_v51  ;;  %939 = vmatpush1.bf16.msra.mxu1 %v2939_v53 }
  0x60   :  { %940 = vmatprep.subr.bf16.mxu1 %v2947_v55  ;;  %v3005_v55 = vld [vmem:[%s3930_s3 + $0x208] ss:$16 sps:$4 sm:$0xff]  }
  0x62   :  { %859 = vmatpush1.bf16.msra.mxu0 %v2942_v52 }
  0x63   :  { %860 = vmatprep.subr.bf16.mxu0 %v2950_v54  ;;  %941 = vmatpush1.bf16.msra.mxu1 %v2945_v57  ;;  %v3002_v54 = vld [vmem:[%s3930_s3 + $0x200] ss:$16 sps:$4 sm:$0xff]   ;;  %v3010_v57 = vld [vmem:[%s3930_s3 + $0x224] ss:$16 sps:$4 sm:$0xff]  }
  0x64   :  { %942 = vmatprep.subr.bf16.mxu1 %v2953_v59  ;;  %v3008_v59 = vld [vmem:[%s3930_s3 + $0x220] ss:$16 sps:$4 sm:$0xff]  }
  0x66   :  { %861 = vmatpush1.bf16.msra.mxu0 %v2948_v56 }
  0x67   :  { %862 = vmatprep.subr.bf16.mxu0 %v2956_v58  ;;  %943 = vmatpush1.bf16.msra.mxu1 %v2951_v61  ;;  %v3013_v58 = vld [vmem:[%s3930_s3 + $0x22c] ss:$16 sps:$4 sm:$0xff]   ;;  %v3016_v61 = vld [vmem:[%s3930_s3 + $0x244] ss:$16 sps:$4 sm:$0xff]  }
  0x68   :  { %944 = vmatprep.subr.bf16.mxu1 %v2959_v63  ;;  %v3014_v63 = vld [vmem:[%s3930_s3 + $0x240] ss:$16 sps:$4 sm:$0xff]  }
  0x6a   :  { %863 = vmatpush1.bf16.msra.mxu0 %v2954_v60  ;;  %v3011_v60 = vld [vmem:[%s3930_s3 + $0x228] ss:$16 sps:$4 sm:$0xff]  }
  0x6b   :  { %864 = vmatprep.subr.bf16.mxu0 %v2962_v62  ;;  %945 = vmatpush1.bf16.msra.mxu1 %v2957_v2  ;;  %v3019_v62 = vld [vmem:[%s3930_s3 + $0x24c] ss:$16 sps:$4 sm:$0xff]   ;;  %v3022_v2 = vld [vmem:[%s3930_s3 + $0x264] ss:$16 sps:$4 sm:$0xff]  }
  0x6c   :  { %946 = vmatprep.subr.bf16.mxu1 %v2965_v4 }
  0x6e   :  { %865 = vmatpush1.bf16.msra.mxu0 %v2960_v0  ;;  %v3017_v0 = vld [vmem:[%s3930_s3 + $0x248] ss:$16 sps:$4 sm:$0xff]  }
  0x6f   :  { %866 = vmatprep.subr.bf16.mxu0 %v2968_v3  ;;  %947 = vmatpush1.bf16.msra.mxu1 %v2963_v6  ;;  %v3025_v3 = vld [vmem:[%s3930_s3 + $0x26c] ss:$16 sps:$4 sm:$0xff]   ;;  %v3023_v6 = vld [vmem:[%s3930_s3 + $0x268] ss:$16 sps:$4 sm:$0xff]  }
  0x70   :  { %948 = vmatprep.subr.bf16.mxu1 %v2971_v8  ;;  %v3029_v8 = vld [vmem:[%s3932_s5 + $0x8] ss:$12 sps:$4 sm:$0xff]  }
  0x72   :  { %867 = vmatpush1.bf16.msra.mxu0 %v2966_v5  ;;  %v3020_v5 = vld [vmem:[%s3930_s3 + $0x260] ss:$16 sps:$4 sm:$0xff]  }
  0x73   :  { %868 = vmatprep.subr.bf16.mxu0 %v2974_v7  ;;  %949 = vmatpush1.bf16.msra.mxu1 %v2969_v10  ;;  %v3028_v7 = vld [vmem:[%s3932_s5 + $0x4] ss:$12 sps:$4 sm:$0xff]   ;;  %v3026_v10 = vld [vmem:[%s3932_s5] ss:$12 sps:$4 sm:$0xff]  }
  0x74   :  { %950 = vmatprep.subr.bf16.mxu1 %v2977_v11  ;;  %v3032_v11 = vld [vmem:[%s3932_s5 + $0x1c] ss:$12 sps:$4 sm:$0xff]  }
  0x76   :  { %869 = vmatpush1.bf16.msra.mxu0 %v2972_v9 }
  0x77   :  { %951 = vmatpush1.bf16.msra.mxu1 %v2975_v12  ;;  %870 = vmatprep.subr.bf16.mxu0 %v2980_v13  ;;  %v3033_v12 = vld [vmem:[%s3932_s5 + $0x20] ss:$12 sps:$4 sm:$0xff]   ;;  %v3030_v13 = vld [vmem:[%s3932_s5 + $0x18] ss:$12 sps:$4 sm:$0xff]  }
  0x78   :  { %952 = vmatprep.subr.bf16.mxu1 %v2983_v14  ;;  %v3036_v14 = vld [vmem:[%s3932_s5 + $0x34] ss:$12 sps:$4 sm:$0xff]  }
  0x7a   :  { %871 = vmatpush1.bf16.msra.mxu0 %v2978_v15  ;;  %v3037_v15 = vld [vmem:[%s3932_s5 + $0x38] ss:$12 sps:$4 sm:$0xff]  }
  0x7b   :  { %953 = vmatpush1.bf16.msra.mxu1 %v2981_v16  ;;  %872 = vmatprep.subr.bf16.mxu0 %v2986_v17  ;;  %v3034_v16 = vld [vmem:[%s3932_s5 + $0x30] ss:$12 sps:$4 sm:$0xff]   ;;  %v3040_v17 = vld [vmem:[%s3932_s5 + $0x4c] ss:$12 sps:$4 sm:$0xff]  }
  0x7c   :  { %954 = vmatprep.subr.bf16.mxu1 %v2989_v18  ;;  %v3041_v18 = vld [vmem:[%s3932_s5 + $0x50] ss:$12 sps:$4 sm:$0xff]  }
  0x7e   :  { %873 = vmatpush1.bf16.msra.mxu0 %v2984_v19  ;;  %v3038_v19 = vld [vmem:[%s3932_s5 + $0x48] ss:$12 sps:$4 sm:$0xff]  }
  0x7f   :  { %955 = vmatpush1.bf16.msra.mxu1 %v2987_v20  ;;  %874 = vmatprep.subr.bf16.mxu0 %v2992_v21  ;;  %v3044_v20 = vld [vmem:[%s3932_s5 + $0x64] ss:$12 sps:$4 sm:$0xff]   ;;  %v3045_v21 = vld [vmem:[%s3932_s5 + $0x68] ss:$12 sps:$4 sm:$0xff]  }
  0x80   :  { %956 = vmatprep.subr.bf16.mxu1 %v2995_v22  ;;  %v3042_v22 = vld [vmem:[%s3932_s5 + $0x60] ss:$12 sps:$4 sm:$0xff]  }
  0x82   :  { %875 = vmatpush1.bf16.msra.mxu0 %v2990_v23  ;;  %v3048_v23 = vld [vmem:[%s3932_s5 + $0x7c] ss:$12 sps:$4 sm:$0xff]  }
  0x83   :  { %957 = vmatpush1.bf16.msra.mxu1 %v2993_v24  ;;  %876 = vmatprep.subr.bf16.mxu0 %v2998_v25  ;;  %v3049_v24 = vld [vmem:[%s3932_s5 + $0x80] ss:$12 sps:$4 sm:$0xff]   ;;  %v3046_v25 = vld [vmem:[%s3932_s5 + $0x78] ss:$12 sps:$4 sm:$0xff]  }
  0x84   :  { %958 = vmatprep.subr.bf16.mxu1 %v3001_v26  ;;  %v3052_v26 = vld [vmem:[%s3932_s5 + $0x94] ss:$12 sps:$4 sm:$0xff]  }
  0x86   :  { %877 = vmatpush1.bf16.msra.mxu0 %v2996_v27  ;;  %v3053_v27 = vld [vmem:[%s3932_s5 + $0x98] ss:$12 sps:$4 sm:$0xff]  }
  0x87   :  { %959 = vmatpush1.bf16.msra.mxu1 %v2999_v28  ;;  %887 = vmatprep.subr.bf16.mxu0 %v3004_v29  ;;  %v3050_v28 = vld [vmem:[%s3932_s5 + $0x90] ss:$12 sps:$4 sm:$0xff]   ;;  %v3056_v29 = vld [vmem:[%s3932_s5 + $0xac] ss:$12 sps:$4 sm:$0xff]  }
  0x88   :  { %969 = vmatprep.subr.bf16.mxu1 %v3007_v30  ;;  %v3054_v30 = vld [vmem:[%s3932_s5 + $0xa8] ss:$12 sps:$4 sm:$0xff]  }
 0x11c   :  { %v287_v38 = vpop.f32.mrb[0].mxu0 }
 0x11d   :  { %v288_v39 = vadd.f32 %v287_v38, %v113_v36  ;;  %v289_v40 = vpop.f32.mrb[1].mxu0  ;;  %v328_v45 = vpop.f32.mrb[0].mxu1  ;;  %v3063_v36 = vld [vmem:[#allocation2 + $0xc] ss:$16 sps:$4 sm:$0xff]   ;;  %v436_v38 = vsub.s32 3, %v3717_v32 }
 0x11e   :  { %v290_v41 = vadd.f32 %v289_v40, %v117_v37  ;;  %v291_v42 = vpop.f32.mrb[2].mxu0  ;;  %v2732_v46 = vpop.f32.mrb[1].mxu1  ;;  %v329_v51 = vadd.f32 %v328_v45, %v121_v49  ;;  %v417_v37 = vld [vmem:[%s3931_s4] sm:$0xf] }
 0x11f   :  { %3194 = vtanh.f32 %v288_v39  ;;  %v292_v43 = vpop.f32.mrb[3].mxu0  ;;  %v331_v47 = vpop.f32.mrb[2].mxu1  ;;  %v425_v39 = vrot.slane %v417_v37, %v3720_v33  ;;  %v433_v40 = vrot.slane %v417_v37, %v3731_v44  ;;  %v437_v42 = vrot.slane %v417_v37, %v436_v38 }
 0x120   :  { %3196 = vtanh.f32 %v290_v41  ;;  %v2733_v48 = vpop.f32.mrb[3].mxu1  ;;  %v429_v41 = vrot.slane %v417_v37, %v3726_v35  ;;  %v3123_v37 = vld [vmem:[#allocation2 + $0x14c] ss:$16 sps:$4 sm:$0xff]  }
 0x121   :  { %3198 = vtanh.f32 %v329_v51 }
 0x129   :  { %v3195_v50 = vpop.eup %3194 }
 0x12a   :  { %v3197_v52 = vpop.eup %3196  ;;  %v418_v56 = vpack.c.bf16 %v3195_v50, %v3195_v50 }
 0x12b   :  { %v419_v53 = vpack.c.bf16 %v3197_v52, %v3197_v52  ;;  %v3199_v4 = vpop.eup %3198 }
 0x12c   :  { %v420_v9 = vpack.c.bf16 %v3199_v4, %v3199_v4  ;;  %v3073_v4 = vld [vmem:[#allocation2 + $0x48] ss:$16 sps:$4 sm:$0xff]  }
 0x12d   :  { %878 = vmatprep.mubr.bf16.mxu0 %v419_v53  ;;  %960 = vmatprep.mubr.bf16.mxu1 %v419_v53 }
 0x12e   :  { %879 = vmatmul.mubr.bf16.vlgmr.msra.gmra.mrb[4].mxu0 %v418_v56  ;;  %961 = vmatmul.mubr.bf16.vlgmr.msra.gmra.mrb[4].mxu1 %v418_v56 }
 0x12f   :  { %888 = vmatpush1.bf16.msra.mxu0 %v3002_v54  ;;  %970 = vmatpush1.bf16.msra.mxu1 %v3005_v55 }
 0x130   :  { %889 = vmatprep.subr.bf16.mxu0 %v3010_v57  ;;  %971 = vmatprep.subr.bf16.mxu1 %v3013_v58  ;;  %v3058_v58 = vld [vmem:[#allocation2] ss:$16 sps:$4 sm:$0xff]  }
 0x131   :  { %919 = vmatprep.mubr.bf16.mxu0 %v3335_v1  ;;  %1001 = vmatprep.mubr.bf16.mxu1 %v3335_v1 }
 0x133   :  { %890 = vmatpush1.bf16.msra.mxu0 %v3008_v59  ;;  %972 = vmatpush1.bf16.msra.mxu1 %v3011_v60  ;;  %v3061_v59 = vld [vmem:[#allocation2 + $0x8] ss:$16 sps:$4 sm:$0xff]   ;;  %v3066_v60 = vld [vmem:[#allocation2 + $0x24] ss:$16 sps:$4 sm:$0xff]  }
 0x134   :  { %891 = vmatprep.subr.bf16.mxu0 %v3016_v61  ;;  %973 = vmatprep.subr.bf16.mxu1 %v3019_v62  ;;  %v3069_v61 = vld [vmem:[#allocation2 + $0x2c] ss:$16 sps:$4 sm:$0xff]   ;;  %v3064_v62 = vld [vmem:[#allocation2 + $0x20] ss:$16 sps:$4 sm:$0xff]  }
 0x137   :  { %892 = vmatpush1.bf16.msra.mxu0 %v3014_v63  ;;  %974 = vmatpush1.bf16.msra.mxu1 %v3017_v0  ;;  %v3067_v63 = vld [vmem:[#allocation2 + $0x28] ss:$16 sps:$4 sm:$0xff]   ;;  %v3072_v0 = vld [vmem:[#allocation2 + $0x44] ss:$16 sps:$4 sm:$0xff]  }
 0x138   :  { %893 = vmatprep.subr.bf16.mxu0 %v3022_v2  ;;  %975 = vmatprep.subr.bf16.mxu1 %v3025_v3  ;;  %v3075_v2 = vld [vmem:[#allocation2 + $0x4c] ss:$16 sps:$4 sm:$0xff]   ;;  %v3070_v3 = vld [vmem:[#allocation2 + $0x40] ss:$16 sps:$4 sm:$0xff]  }
 0x13b   :  { %894 = vmatpush1.bf16.msra.mxu0 %v3020_v5  ;;  %976 = vmatpush1.bf16.msra.mxu1 %v3023_v6  ;;  %v3078_v5 = vld [vmem:[#allocation2 + $0x64] ss:$16 sps:$4 sm:$0xff]   ;;  %v3081_v6 = vld [vmem:[#allocation2 + $0x6c] ss:$16 sps:$4 sm:$0xff]  }
 0x13c   :  { %1189 = vmatprep.subr.bf16.mxu0 %v3028_v7  ;;  %2734 = vmatprep.subr.bf16.mxu1 %v3029_v8  ;;  %v3076_v7 = vld [vmem:[#allocation2 + $0x60] ss:$16 sps:$4 sm:$0xff]  }
 0x13e   :  { %2535 = vmatmul.mubr.msk.bf16.vlgmr.msra.gmra.mrb[4].mxu0 %vm842_vm1, %v420_v9  ;;  %2536 = vmatmul.mubr.msk.bf16.vlgmr.msra.gmra.mrb[4].mxu1 %vm842_vm1, %v420_v9  ;;  %v3084_v9 = vld [vmem:[#allocation2 + $0x84] ss:$16 sps:$4 sm:$0xff]  }
 0x13f   :  { %1190 = vmatpush1.bf16.msra.mxu0 %v3026_v10  ;;  %2735 = vmatpush3.bf16.msra.mxu1 %v3029_v8  ;;  %v3079_v8 = vld [vmem:[#allocation2 + $0x68] ss:$16 sps:$4 sm:$0xff]   ;;  %v3087_v10 = vld [vmem:[#allocation2 + $0x8c] ss:$16 sps:$4 sm:$0xff]  }
 0x140   :  { %1191 = vmatprep.subr.bf16.mxu0 %v3032_v11  ;;  %2736 = vmatprep.subr.bf16.mxu1 %v3033_v12  ;;  %v3082_v11 = vld [vmem:[#allocation2 + $0x80] ss:$16 sps:$4 sm:$0xff]  }
 0x141   :  { %1221 = vmatprep.mubr.bf16.mxu0 %v3335_v1 }
 0x143   :  { %1192 = vmatpush1.bf16.msra.mxu0 %v3030_v13  ;;  %2737 = vmatpush3.bf16.msra.mxu1 %v3033_v12  ;;  %v3085_v12 = vld [vmem:[#allocation2 + $0x88] ss:$16 sps:$4 sm:$0xff]   ;;  %v3090_v13 = vld [vmem:[#allocation2 + $0xa4] ss:$16 sps:$4 sm:$0xff]  }
 0x144   :  { %1193 = vmatprep.subr.bf16.mxu0 %v3036_v14  ;;  %2738 = vmatprep.subr.bf16.mxu1 %v3037_v15  ;;  %v3093_v14 = vld [vmem:[#allocation2 + $0xac] ss:$16 sps:$4 sm:$0xff]  }
 0x147   :  { %1194 = vmatpush1.bf16.msra.mxu0 %v3034_v16  ;;  %2739 = vmatpush3.bf16.msra.mxu1 %v3037_v15  ;;  %v3088_v15 = vld [vmem:[#allocation2 + $0xa0] ss:$16 sps:$4 sm:$0xff]   ;;  %v3091_v16 = vld [vmem:[#allocation2 + $0xa8] ss:$16 sps:$4 sm:$0xff]  }
 0x148   :  { %1195 = vmatprep.subr.bf16.mxu0 %v3040_v17  ;;  %2740 = vmatprep.subr.bf16.mxu1 %v3041_v18  ;;  %v3096_v17 = vld [vmem:[#allocation2 + $0xc4] ss:$16 sps:$4 sm:$0xff]  }
 0x14b   :  { %1196 = vmatpush1.bf16.msra.mxu0 %v3038_v19  ;;  %2741 = vmatpush3.bf16.msra.mxu1 %v3041_v18  ;;  %v3099_v18 = vld [vmem:[#allocation2 + $0xcc] ss:$16 sps:$4 sm:$0xff]   ;;  %v3094_v19 = vld [vmem:[#allocation2 + $0xc0] ss:$16 sps:$4 sm:$0xff]  }
 0x14c   :  { %1197 = vmatprep.subr.bf16.mxu0 %v3044_v20  ;;  %2742 = vmatprep.subr.bf16.mxu1 %v3045_v21  ;;  %v3097_v20 = vld [vmem:[#allocation2 + $0xc8] ss:$16 sps:$4 sm:$0xff]  }
 0x14f   :  { %1198 = vmatpush1.bf16.msra.mxu0 %v3042_v22  ;;  %2743 = vmatpush3.bf16.msra.mxu1 %v3045_v21  ;;  %v3102_v21 = vld [vmem:[#allocation2 + $0xe4] ss:$16 sps:$4 sm:$0xff]   ;;  %v3105_v22 = vld [vmem:[#allocation2 + $0xec] ss:$16 sps:$4 sm:$0xff]  }
 0x150   :  { %1199 = vmatprep.subr.bf16.mxu0 %v3048_v23  ;;  %2744 = vmatprep.subr.bf16.mxu1 %v3049_v24  ;;  %v3100_v23 = vld [vmem:[#allocation2 + $0xe0] ss:$16 sps:$4 sm:$0xff]  }
 0x153   :  { %1200 = vmatpush1.bf16.msra.mxu0 %v3046_v25  ;;  %2745 = vmatpush3.bf16.msra.mxu1 %v3049_v24  ;;  %v3103_v24 = vld [vmem:[#allocation2 + $0xe8] ss:$16 sps:$4 sm:$0xff]   ;;  %v3108_v25 = vld [vmem:[#allocation2 + $0x104] ss:$16 sps:$4 sm:$0xff]  }
 0x154   :  { %1201 = vmatprep.subr.bf16.mxu0 %v3052_v26  ;;  %2746 = vmatprep.subr.bf16.mxu1 %v3053_v27  ;;  %v3111_v26 = vld [vmem:[#allocation2 + $0x10c] ss:$16 sps:$4 sm:$0xff]  }
 0x157   :  { %1202 = vmatpush1.bf16.msra.mxu0 %v3050_v28  ;;  %2747 = vmatpush3.bf16.msra.mxu1 %v3053_v27  ;;  %v3106_v27 = vld [vmem:[#allocation2 + $0x100] ss:$16 sps:$4 sm:$0xff]   ;;  %v3109_v28 = vld [vmem:[#allocation2 + $0x108] ss:$16 sps:$4 sm:$0xff]  }
 0x158   :  { %1203 = vmatprep.subr.bf16.mxu0 %v3056_v29  ;;  %2748 = vmatprep.subr.bf16.mxu1 %v3057_v31  ;;  %v3114_v29 = vld [vmem:[#allocation2 + $0x124] ss:$16 sps:$4 sm:$0xff]  }
 0x15b   :  { %1204 = vmatpush1.bf16.msra.mxu0 %v3054_v30  ;;  %2749 = vmatpush3.bf16.msra.mxu1 %v3057_v31  ;;  %v3117_v30 = vld [vmem:[#allocation2 + $0x12c] ss:$16 sps:$4 sm:$0xff]   ;;  %v3112_v31 = vld [vmem:[#allocation2 + $0x120] ss:$16 sps:$4 sm:$0xff]  }
 0x15c   :  { %1817 = vmatprep.subr.bf16.mxu0 %v3060_v34  ;;  %1923 = vmatprep.subr.bf16.mxu1 %v3063_v36  ;;  %v3115_v34 = vld [vmem:[#allocation2 + $0x128] ss:$16 sps:$4 sm:$0xff]   ;;  %v3120_v36 = vld [vmem:[#allocation2 + $0x144] ss:$16 sps:$4 sm:$0xff]  }
 0x211   :  { %v921_v43 = vpop.f32.mrb[4].mxu0  ;;  %v1003_v45 = vpop.f32.mrb[4].mxu1 }
 0x212   :  { %v2818_v46 = vadd.f32 %v921_v43, %v425_v39  ;;  %v2820_v47 = vadd.f32 %v1003_v45, %v433_v40  ;;  %v923_v48 = vpop.f32.mrb[5].mxu0  ;;  %v1005_v49 = vpop.f32.mrb[5].mxu1  ;;  %v3118_v39 = vld [vmem:[#allocation2 + $0x140] ss:$16 sps:$4 sm:$0xff]   ;;  %v3121_v40 = vld [vmem:[#allocation2 + $0x148] ss:$16 sps:$4 sm:$0xff]  }
 0x213   :  { %v2819_v50 = vadd.f32 %v923_v48, %v429_v41  ;;  %v2821_v51 = vadd.f32 %v1005_v49, %v437_v42  ;;  %v925_v52 = vpop.f32.mrb[6].mxu0  ;;  %v1007_v53 = vpop.f32.mrb[6].mxu1  ;;  %v3126_v41 = vld [vmem:[#allocation2 + $0x164] ss:$16 sps:$4 sm:$0xff]   ;;  %v3124_v42 = vld [vmem:[#allocation2 + $0x160] ss:$16 sps:$4 sm:$0xff]  }
 0x214   :  { %v926_v54 = vpop.f32.mrb[7].mxu0  ;;  %v1008_v55 = vpop.f32.mrb[7].mxu1  ;;  %v3129_v43 = vld [vmem:[#allocation2 + $0x16c] ss:$16 sps:$4 sm:$0xff]   ;;  %v3127_v45 = vld [vmem:[#allocation2 + $0x168] ss:$16 sps:$4 sm:$0xff]  }
 0x215   :  { %v1043_v56 = vpack.c.bf16 %v2819_v50, %v2818_v46  ;;  %v1044_v57 = vpack.c.bf16 %v2821_v51, %v2820_v47  ;;  %v3132_v46 = vld [vmem:[#allocation2 + $0x184] ss:$16 sps:$4 sm:$0xff]   ;;  %v3135_v47 = vld [vmem:[#allocation2 + $0x18c] ss:$16 sps:$4 sm:$0xff]   ;;  %v3130_v48 = vld [vmem:[#allocation2 + $0x180] ss:$16 sps:$4 sm:$0xff]  }
 0x216   :  { %v3133_v49 = vld [vmem:[#allocation2 + $0x188] ss:$16 sps:$4 sm:$0xff]   ;;  %v3138_v50 = vld [vmem:[#allocation2 + $0x1a4] ss:$16 sps:$4 sm:$0xff]   ;;  %v3141_v51 = vld [vmem:[#allocation2 + $0x1ac] ss:$16 sps:$4 sm:$0xff]  }
 0x217   :  { %1222 = vmatmul.mubr.bf16.vlgmr.msra.gmra.mrb[8].mxu0 %v1043_v56  ;;  %2750 = vmatprep.mubr.bf16.mxu1 %v1043_v56  ;;  %v3136_v52 = vld [vmem:[#allocation2 + $0x1a0] ss:$16 sps:$4 sm:$0xff]   ;;  %v3139_v53 = vld [vmem:[#allocation2 + $0x1a8] ss:$16 sps:$4 sm:$0xff]   ;;  %v3144_v54 = vld [vmem:[#allocation2 + $0x1c4] ss:$16 sps:$4 sm:$0xff]  }
 0x218   :  { %2751 = vmatmul.mubr.bf16.vlgmr.msra.gmra.mrb[8].mxu1 %v1044_v57  ;;  %1231 = vmatprep.mubr.bf16.mxu0 %v3335_v1  ;;  %v3147_v55 = vld [vmem:[#allocation2 + $0x1cc] ss:$16 sps:$4 sm:$0xff]   ;;  %v3142_v56 = vld [vmem:[#allocation2 + $0x1c0] ss:$16 sps:$4 sm:$0xff]  }
 0x219   :  { %1818 = vmatpush1.bf16.msra.mxu0 %v3058_v58  ;;  %1924 = vmatpush1.bf16.msra.mxu1 %v3061_v59  ;;  %v3150_v58 = vld [vmem:[#allocation2 + $0x1e4] ss:$16 sps:$4 sm:$0xff]   ;;  %v3153_v59 = vld [vmem:[#allocation2 + $0x1ec] ss:$16 sps:$4 sm:$0xff]  }
 0x21a   :  { %1819 = vmatprep.subr.bf16.mxu0 %v3066_v60  ;;  %1925 = vmatprep.subr.bf16.mxu1 %v3069_v61  ;;  %v3148_v60 = vld [vmem:[#allocation2 + $0x1e0] ss:$16 sps:$4 sm:$0xff]   ;;  %v3151_v61 = vld [vmem:[#allocation2 + $0x1e8] ss:$16 sps:$4 sm:$0xff]  }
 0x21d   :  { %1820 = vmatpush1.bf16.msra.mxu0 %v3064_v62  ;;  %1926 = vmatpush1.bf16.msra.mxu1 %v3067_v63  ;;  %v3156_v62 = vld [vmem:[#allocation2 + $0x204] ss:$16 sps:$4 sm:$0xff]   ;;  %v3159_v63 = vld [vmem:[#allocation2 + $0x20c] ss:$16 sps:$4 sm:$0xff]  }
 0x21e   :  { %1821 = vmatprep.subr.bf16.mxu0 %v3072_v0  ;;  %1927 = vmatprep.subr.bf16.mxu1 %v3075_v2  ;;  %v1042_v0 = vld [vmem:[%s3933_s6] sm:$0x7] }
 0x21f   :  { %1232 = vmatmul.mubr.bf16.gmra.mrb[12].mxu0 %v1044_v57  ;;  %v3145_v57 = vld [vmem:[#allocation2 + $0x1c8] ss:$16 sps:$4 sm:$0xff]   ;;  %v1049_v2 = vrot.slane %v1042_v0, %v3720_v33 }
 0x221   :  { %1822 = vmatpush1.bf16.msra.mxu0 %v3070_v3  ;;  %1928 = vmatpush1.bf16.msra.mxu1 %v3073_v4  ;;  %v1053_v3 = vrot.slane %v1042_v0, %v3726_v35  ;;  %v1057_v4 = vrot.slane %v1042_v0, %v3731_v44  ;;  %v3172_v0 = vld [vmem:[#allocation2 + $0x260] ss:$16 sps:$4 sm:$0xff]  }
 0x222   :  { %1823 = vmatprep.subr.bf16.mxu0 %v3078_v5  ;;  %1929 = vmatprep.subr.bf16.mxu1 %v3081_v6 }
 0x225   :  { %1824 = vmatpush1.bf16.msra.mxu0 %v3076_v7  ;;  %1930 = vmatpush1.bf16.msra.mxu1 %v3079_v8 }
 0x226   :  { %1825 = vmatprep.subr.bf16.mxu0 %v3084_v9  ;;  %1931 = vmatprep.subr.bf16.mxu1 %v3087_v10 }
 0x229   :  { %1826 = vmatpush1.bf16.msra.mxu0 %v3082_v11  ;;  %1932 = vmatpush1.bf16.msra.mxu1 %v3085_v12 }
 0x22a   :  { %1827 = vmatprep.subr.bf16.mxu0 %v3090_v13  ;;  %1933 = vmatprep.subr.bf16.mxu1 %v3093_v14 }
 0x22d   :  { %1828 = vmatpush1.bf16.msra.mxu0 %v3088_v15  ;;  %1934 = vmatpush1.bf16.msra.mxu1 %v3091_v16 }
 0x22e   :  { %1829 = vmatprep.subr.bf16.mxu0 %v3096_v17  ;;  %1935 = vmatprep.subr.bf16.mxu1 %v3099_v18 }
 0x231   :  { %1830 = vmatpush1.bf16.msra.mxu0 %v3094_v19  ;;  %1936 = vmatpush1.bf16.msra.mxu1 %v3097_v20 }
 0x232   :  { %1831 = vmatprep.subr.bf16.mxu0 %v3102_v21  ;;  %1937 = vmatprep.subr.bf16.mxu1 %v3105_v22 }
 0x235   :  { %1832 = vmatpush1.bf16.msra.mxu0 %v3100_v23  ;;  %1938 = vmatpush1.bf16.msra.mxu1 %v3103_v24 }
 0x236   :  { %1833 = vmatprep.subr.bf16.mxu0 %v3108_v25  ;;  %1939 = vmatprep.subr.bf16.mxu1 %v3111_v26 }
 0x239   :  { %1834 = vmatpush1.bf16.msra.mxu0 %v3106_v27  ;;  %1940 = vmatpush1.bf16.msra.mxu1 %v3109_v28 }
 0x23a   :  { %1835 = vmatprep.subr.bf16.mxu0 %v3114_v29  ;;  %1941 = vmatprep.subr.bf16.mxu1 %v3117_v30 }
 0x23d   :  { %1836 = vmatpush1.bf16.msra.mxu0 %v3112_v31  ;;  %1942 = vmatpush1.bf16.msra.mxu1 %v3115_v34 }
 0x23e   :  { %1837 = vmatprep.subr.bf16.mxu0 %v3120_v36  ;;  %1943 = vmatprep.subr.bf16.mxu1 %v3123_v37 }
 0x241   :  { %1838 = vmatpush1.bf16.msra.mxu0 %v3118_v39  ;;  %1944 = vmatpush1.bf16.msra.mxu1 %v3121_v40 }
 0x242   :  { %1839 = vmatprep.subr.bf16.mxu0 %v3126_v41  ;;  %1945 = vmatprep.subr.bf16.mxu1 %v3129_v43  ;;  %v3157_v43 = vld [vmem:[#allocation2 + $0x208] ss:$16 sps:$4 sm:$0xff]  }
 0x245   :  { %1840 = vmatpush1.bf16.msra.mxu0 %v3124_v42  ;;  %1946 = vmatpush1.bf16.msra.mxu1 %v3127_v45  ;;  %v3154_v42 = vld [vmem:[#allocation2 + $0x200] ss:$16 sps:$4 sm:$0xff]  }
 0x246   :  { %1841 = vmatprep.subr.bf16.mxu0 %v3132_v46  ;;  %1947 = vmatprep.subr.bf16.mxu1 %v3135_v47  ;;  %v3162_v46 = vld [vmem:[#allocation2 + $0x224] ss:$16 sps:$4 sm:$0xff]   ;;  %v3165_v47 = vld [vmem:[#allocation2 + $0x22c] ss:$16 sps:$4 sm:$0xff]  }
 0x249   :  { %1842 = vmatpush1.bf16.msra.mxu0 %v3130_v48  ;;  %1948 = vmatpush1.bf16.msra.mxu1 %v3133_v49 }
 0x24a   :  { %1843 = vmatprep.subr.bf16.mxu0 %v3138_v50  ;;  %1949 = vmatprep.subr.bf16.mxu1 %v3141_v51 }
 0x24d   :  { %1844 = vmatpush1.bf16.msra.mxu0 %v3136_v52  ;;  %1950 = vmatpush1.bf16.msra.mxu1 %v3139_v53  ;;  %v3160_v53 = vld [vmem:[#allocation2 + $0x220] ss:$16 sps:$4 sm:$0xff]  }
 0x24e   :  { %1845 = vmatprep.subr.bf16.mxu0 %v3144_v54  ;;  %1951 = vmatprep.subr.bf16.mxu1 %v3147_v55  ;;  %v3163_v54 = vld [vmem:[#allocation2 + $0x228] ss:$16 sps:$4 sm:$0xff]  }
 0x251   :  { %1846 = vmatpush1.bf16.msra.mxu0 %v3142_v56  ;;  %1952 = vmatpush1.bf16.msra.mxu1 %v3145_v57  ;;  %v3168_v56 = vld [vmem:[#allocation2 + $0x244] ss:$16 sps:$4 sm:$0xff]  }
 0x252   :  { %1847 = vmatprep.subr.bf16.mxu0 %v3150_v58  ;;  %1953 = vmatprep.subr.bf16.mxu1 %v3153_v59  ;;  %v3171_v59 = vld [vmem:[#allocation2 + $0x24c] ss:$16 sps:$4 sm:$0xff]  }
 0x255   :  { %1848 = vmatpush1.bf16.msra.mxu0 %v3148_v60  ;;  %1954 = vmatpush1.bf16.msra.mxu1 %v3151_v61  ;;  %v3166_v60 = vld [vmem:[#allocation2 + $0x240] ss:$16 sps:$4 sm:$0xff]   ;;  %v3169_v61 = vld [vmem:[#allocation2 + $0x248] ss:$16 sps:$4 sm:$0xff]  }
 0x256   :  { %1870 = vmatprep.subr.bf16.mxu0 %v3156_v62  ;;  %1976 = vmatprep.subr.bf16.mxu1 %v3159_v63  ;;  %v3174_v62 = vld [vmem:[#allocation2 + $0x264] ss:$16 sps:$4 sm:$0xff]   ;;  %v3177_v63 = vld [vmem:[#allocation2 + $0x26c] ss:$16 sps:$4 sm:$0xff]  }
 0x2ea   :  { %v1223_v5 = vpop.f32.mrb[8].mxu0 }
 0x2eb   :  { %v1224_v6 = vadd.f32 %v1223_v5, %v1049_v2  ;;  %v1225_v7 = vpop.f32.mrb[9].mxu0  ;;  %v2752_v8 = vpop.f32.mrb[8].mxu1  ;;  %v3180_v5 = vld [vmem:[%s3936_s9 + $0x10] sm:$0xff]  }
 0x2ec   :  { %v1226_v9 = vadd.f32 %v1225_v7, %v1053_v3  ;;  %v1285_v10 = vadd.f32 %v2752_v8, %v1057_v4  ;;  %v1227_v11 = vpop.f32.mrb[10].mxu0  ;;  %v1276_v12 = vpop.f32.mrb[9].mxu1  ;;  %v3183_v7 = vld [vmem:[%s3936_s9 + $0x28] sm:$0xff]   ;;  %v3184_v8 = vld [vmem:[%s3936_s9 + $0x30] sm:$0xff]  }
 0x2ed   :  { %3200 = vtanh.f32 %v1224_v6  ;;  %v1228_v13 = vadd.f32 %v1227_v11, %v1049_v2  ;;  %v1277_v14 = vadd.f32 %v1276_v12, %v1057_v4  ;;  %v1229_v15 = vpop.f32.mrb[11].mxu0  ;;  %v2753_v16 = vpop.f32.mrb[10].mxu1  ;;  %v3181_v6 = vld [vmem:[%s3936_s9 + $0x18] sm:$0xff]   ;;  %v3187_v11 = vld [vmem:[#allocation5 + $0x8] sm:$0xff]   ;;  %v3188_v12 = vld [vmem:[#allocation5 + $0x10] sm:$0xff]  }
 0x2ee   :  { %3202 = vtanh.f32 %v1226_v9  ;;  %v1230_v17 = vadd.f32 %v1229_v15, %v1053_v3  ;;  %v1279_v18 = vpop.f32.mrb[11].mxu1  ;;  %v1288_v19 = vadd.f32 %v2753_v16, %v1057_v4  ;;  %v3185_v9 = vld [vmem:[%s3936_s9 + $0x38] sm:$0xff]  }
 0x2ef   :  { %3204 = vtanh.f32 %v1285_v10  ;;  %v1280_v20 = vadd.f32 %v1279_v18, %v1057_v4  ;;  %v3179_v4 = vld [vmem:[%s3936_s9 + $0x8] sm:$0xff]   ;;  %v3186_v10 = vld [vmem:[#allocation5] sm:$0xff]  }
 0x2f0   :  { %3206 = vtanh.f32 %v1228_v13  ;;  %v1383_v13 = vld [vmem:[%s3935_s8] sm:$0xf] }
 0x2f1   :  { %3208 = vtanh.f32 %v1277_v14  ;;  %v1406_v14 = vrot.slane %v1383_v13, %v436_v38  ;;  %v1394_v15 = vrot.slane %v1383_v13, %v3720_v33  ;;  %v1402_v16 = vrot.slane %v1383_v13, %v3731_v44 }
 0x2f2   :  { %3210 = vtanh.f32 %v1230_v17  ;;  %v1233_v21 = vpop.f32.mrb[12].mxu0 }
 0x2f3   :  { %3212 = vtanh.f32 %v1288_v19  ;;  %v1234_v22 = vadd.f32 %v1233_v21, %v1049_v2  ;;  %v1235_v23 = vpop.f32.mrb[13].mxu0  ;;  %v1398_v19 = vrot.slane %v1383_v13, %v3726_v35 }
 0x2f4   :  { %3214 = vtanh.f32 %v1280_v20  ;;  %v1236_v24 = vadd.f32 %v1235_v23, %v1053_v3  ;;  %v1237_v25 = vpop.f32.mrb[14].mxu0 }
 0x2f5   :  { %3216 = vtanh.f32 %v1234_v22  ;;  %v1238_v26 = vadd.f32 %v1237_v25, %v1049_v2  ;;  %v1239_v27 = vpop.f32.mrb[15].mxu0  ;;  %v3175_v2 = vld [vmem:[#allocation2 + $0x268] ss:$16 sps:$4 sm:$0xff]  }
 0x2f6   :  { %3218 = vtanh.f32 %v1236_v24  ;;  %v1240_v28 = vadd.f32 %v1239_v27, %v1053_v3  ;;  %v3178_v3 = vld [vmem:[%s3936_s9] sm:$0xff]  }
 0x2f7   :  { %v3201_v29 = vpop.eup %3200  ;;  %3220 = vtanh.f32 %v1238_v26 }
 0x2f8   :  { %v3203_v30 = vpop.eup %3202  ;;  %3222 = vtanh.f32 %v1240_v28 }
 0x2f9   :  { %v3205_v31 = vpop.eup %3204 }
 0x2fa   :  { %v3207_v34 = vpop.eup %3206 }
 0x2fb   :  { %v3209_v36 = vpop.eup %3208  ;;  %v1384_v37 = vpack.c.bf16 %v3207_v34, %v3201_v29 }
 0x2fc   :  { %v3211_v39 = vpop.eup %3210 }
 0x2fd   :  { %v3213_v40 = vpop.eup %3212  ;;  %v1385_v41 = vpack.c.bf16 %v3211_v39, %v3203_v30 }
 0x2fe   :  { %v3215_v45 = vpop.eup %3214  ;;  %v1389_v48 = vpack.c.bf16 %v3213_v40, %v3205_v31 }
 0x2ff   :  { %v3217_v49 = vpop.eup %3216  ;;  %v1386_v50 = vpack.c.bf16 %v3215_v45, %v3209_v36  ;;  %1849 = vmatprep.mubr.bf16.mxu0 %v1385_v41  ;;  %1955 = vmatprep.mubr.bf16.mxu1 %v1385_v41 }
 0x300   :  { %v3219_v51 = vpop.eup %3218  ;;  %1850 = vmatmul.mubr.bf16.vlgmr.msra.gmra.mrb[16].mxu0 %v1384_v37  ;;  %1956 = vmatmul.mubr.bf16.vlgmr.msra.gmra.mrb[12].mxu1 %v1384_v37 }
 0x301   :  { %v3221_v52 = vpop.eup %3220  ;;  %1871 = vmatpush1.bf16.msra.mxu0 %v3154_v42  ;;  %1977 = vmatpush1.bf16.msra.mxu1 %v3157_v43 }
 0x302   :  { %v3223_v55 = vpop.eup %3222  ;;  %1872 = vmatprep.subr.bf16.mxu0 %v3162_v46  ;;  %1978 = vmatprep.subr.bf16.mxu1 %v3165_v47  ;;  %v1387_v57 = vpack.c.bf16 %v3221_v52, %v3217_v49 }
 0x303   :  { %v1388_v58 = vpack.c.bf16 %v3223_v55, %v3219_v51 }
 0x305   :  { %1873 = vmatpush1.bf16.msra.mxu0 %v3160_v53  ;;  %1979 = vmatpush1.bf16.msra.mxu1 %v3163_v54 }
 0x306   :  { %1859 = vmatprep.mubr.bf16.mxu0 %v1388_v58  ;;  %1874 = vmatprep.subr.bf16.mxu0 %v3168_v56 }
 0x307   :  { %1965 = vmatprep.mubr.bf16.mxu1 %v1388_v58  ;;  %1980 = vmatprep.subr.bf16.mxu1 %v3171_v59  ;;  %v3189_v58 = vld [vmem:[#allocation5 + $0x18] sm:$0xff]   ;;  %v3190_v59 = vld [vmem:[#allocation5 + $0x20] sm:$0xff]  }
 0x308   :  { %1860 = vmatmul.mubr.bf16.gmra.mrb[20].mxu0 %v1387_v57  ;;  %1966 = vmatmul.mubr.bf16.gmra.mrb[16].mxu1 %v1387_v57 }
 0x309   :  { %1875 = vmatpush1.bf16.msra.mxu0 %v3166_v60  ;;  %1981 = vmatpush1.bf16.msra.mxu1 %v3169_v61  ;;  %v3191_v60 = vld [vmem:[#allocation5 + $0x28] sm:$0xff]   ;;  %v3192_v61 = vld [vmem:[#allocation5 + $0x30] sm:$0xff]  }
 0x30a   :  { %1876 = vmatprep.subr.bf16.mxu0 %v3174_v62  ;;  %1982 = vmatprep.subr.bf16.mxu1 %v3177_v63  ;;  %v3193_v62 = vld [vmem:[#allocation5 + $0x38] sm:$0xff]   ;;  %v2645_v63 = vld [vmem:[%s3937_s10] ss:$0 sm:$0xff] }
 0x30b   :  { %1902 = vmatprep.mubr.bf16.mxu0 %v3335_v1  ;;  %2008 = vmatprep.mubr.bf16.mxu1 %v3335_v1 }
 0x30d   :  { %1877 = vmatpush1.bf16.msra.mxu0 %v3172_v0  ;;  %1983 = vmatpush1.bf16.msra.mxu1 %v3175_v2 }
 0x30e   :  { %2754 = vmatprep.subr.bf16.mxu0 %v3178_v3  ;;  %2786 = vmatprep.subr.bf16.mxu1 %v3186_v10 }
 0x310   :  { %2641 = vmatmul.mubr.msk.bf16.vlgmr.msra.gmra.mrb[16].mxu0 %vm842_vm1, %v1386_v50  ;;  %2643 = vmatmul.mubr.msk.bf16.vlgmr.msra.gmra.mrb[12].mxu1 %vm842_vm1, %v1386_v50 }
 0x311   :  { %1912 = vmatprep.mubr.bf16.mxu0 %v3335_v1  ;;  %2018 = vmatprep.mubr.bf16.mxu1 %v3335_v1  ;;  %v3182_v1 = vld [vmem:[%s3936_s9 + $0x20] sm:$0xff]  }
 0x312   :  { %2755 = vmatpush3.bf16.msra.mxu0 %v3178_v3  ;;  %2787 = vmatpush3.bf16.msra.mxu1 %v3186_v10 }
 0x313   :  { %2756 = vmatprep.subr.bf16.mxu0 %v3179_v4  ;;  %2788 = vmatprep.subr.bf16.mxu1 %v3187_v11 }
 0x316   :  { %2757 = vmatpush3.bf16.msra.mxu0 %v3179_v4  ;;  %2789 = vmatpush3.bf16.msra.mxu1 %v3187_v11 }
 0x317   :  { %2758 = vmatprep.subr.bf16.mxu0 %v3180_v5  ;;  %2790 = vmatprep.subr.bf16.mxu1 %v3188_v12 }
 0x318   :  { %2642 = vmatmul.mubr.msk.bf16.gmra.mrb[20].mxu0 %vm842_vm1, %v1389_v48  ;;  %2644 = vmatmul.mubr.msk.bf16.gmra.mrb[16].mxu1 %vm842_vm1, %v1389_v48 }
 0x31a   :  { %2759 = vmatpush3.bf16.msra.mxu0 %v3180_v5  ;;  %2791 = vmatpush3.bf16.msra.mxu1 %v3188_v12 }
 0x31b   :  { %2760 = vmatprep.subr.bf16.mxu0 %v3181_v6  ;;  %2792 = vmatprep.subr.bf16.mxu1 %v3189_v58 }
 0x31e   :  { %2761 = vmatpush3.bf16.msra.mxu0 %v3181_v6  ;;  %2793 = vmatpush3.bf16.msra.mxu1 %v3189_v58 }
 0x31f   :  { %2762 = vmatprep.subr.bf16.mxu0 %v3182_v1  ;;  %2794 = vmatprep.subr.bf16.mxu1 %v3190_v59 }
 0x322   :  { %2763 = vmatpush3.bf16.msra.mxu0 %v3182_v1  ;;  %2795 = vmatpush3.bf16.msra.mxu1 %v3190_v59 }
 0x323   :  { %2764 = vmatprep.subr.bf16.mxu0 %v3183_v7  ;;  %2796 = vmatprep.subr.bf16.mxu1 %v3191_v60 }
 0x326   :  { %2765 = vmatpush3.bf16.msra.mxu0 %v3183_v7  ;;  %2797 = vmatpush3.bf16.msra.mxu1 %v3191_v60 }
 0x327   :  { %2766 = vmatprep.subr.bf16.mxu0 %v3184_v8  ;;  %2798 = vmatprep.subr.bf16.mxu1 %v3192_v61 }
 0x32a   :  { %2767 = vmatpush3.bf16.msra.mxu0 %v3184_v8  ;;  %2799 = vmatpush3.bf16.msra.mxu1 %v3192_v61 }
 0x32b   :  { %2768 = vmatprep.subr.bf16.mxu0 %v3185_v9  ;;  %2800 = vmatprep.subr.bf16.mxu1 %v3193_v62 }
 0x32e   :  { %2769 = vmatpush3.bf16.msra.mxu0 %v3185_v9  ;;  %2801 = vmatpush3.bf16.msra.mxu1 %v3193_v62 }
 0x3e3   :  { %v1904_v17 = vpop.f32.mrb[16].mxu0  ;;  %v2010_v18 = vpop.f32.mrb[12].mxu1 }
 0x3e4   :  { %v1906_v20 = vpop.f32.mrb[17].mxu0  ;;  %v2012_v21 = vpop.f32.mrb[13].mxu1  ;;  %v2822_v25 = vadd.f32 %v1904_v17, %v1394_v15  ;;  %v2830_v26 = vadd.f32 %v2010_v18, %v1402_v16 }
 0x3e5   :  { %v2831_v22 = vadd.f32 %v2012_v21, %v1406_v14  ;;  %v1908_v23 = vpop.f32.mrb[18].mxu0  ;;  %v2014_v24 = vpop.f32.mrb[14].mxu1  ;;  %v2823_v38 = vadd.f32 %v1906_v20, %v1398_v19 }
 0x3e6   :  { %v2824_v27 = vadd.f32 %v1908_v23, %v1394_v15  ;;  %v2832_v28 = vadd.f32 %v2014_v24, %v1402_v16  ;;  %v1910_v29 = vpop.f32.mrb[19].mxu0  ;;  %v2016_v32 = vpop.f32.mrb[15].mxu1 }
 0x3e7   :  { %v2825_v30 = vadd.f32 %v1910_v29, %v1398_v19  ;;  %v2833_v33 = vadd.f32 %v2016_v32, %v1406_v14 }
 0x3e8   :  { %v2046_v31 = vpack.c.bf16 %v2824_v27, %v2822_v25  ;;  %v2050_v44 = vpack.c.bf16 %v2832_v28, %v2830_v26 }
 0x3e9   :  { %v2048_v34 = vpack.c.bf16 %v2825_v30, %v2823_v38  ;;  %v2052_v36 = vpack.c.bf16 %v2833_v33, %v2831_v22 }
 0x3ea   :  { %2770 = vmatprep.mubr.bf16.mxu0 %v2046_v31 }
 0x3eb   :  { %v1914_v35 = vpop.f32.mrb[20].mxu0  ;;  %v2020_v37 = vpop.f32.mrb[16].mxu1 }
 0x3ec   :  { %v1916_v39 = vpop.f32.mrb[21].mxu0  ;;  %v2022_v40 = vpop.f32.mrb[17].mxu1  ;;  %v2826_v45 = vadd.f32 %v1914_v35, %v1394_v15  ;;  %v2834_v46 = vadd.f32 %v2020_v37, %v1402_v16 }
 0x3ed   :  { %v2835_v41 = vadd.f32 %v2022_v40, %v1406_v14  ;;  %v1918_v42 = vpop.f32.mrb[22].mxu0  ;;  %v2024_v43 = vpop.f32.mrb[18].mxu1  ;;  %v2827_v51 = vadd.f32 %v1916_v39, %v1398_v19 }
 0x3ee   :  { %v2828_v47 = vadd.f32 %v1918_v42, %v1394_v15  ;;  %v2836_v48 = vadd.f32 %v2024_v43, %v1402_v16  ;;  %v1920_v49 = vpop.f32.mrb[23].mxu0  ;;  %v2026_v50 = vpop.f32.mrb[19].mxu1 }
 0x3ef   :  { %v2829_v52 = vadd.f32 %v1920_v49, %v1398_v19  ;;  %v2837_v53 = vadd.f32 %v2026_v50, %v1406_v14 }
 0x3f0   :  { %v2047_v54 = vpack.c.bf16 %v2828_v47, %v2826_v45  ;;  %v2051_v55 = vpack.c.bf16 %v2836_v48, %v2834_v46 }
 0x3f1   :  { %v2049_v56 = vpack.c.bf16 %v2829_v52, %v2827_v51  ;;  %v2053_v57 = vpack.c.bf16 %v2837_v53, %v2835_v41 }
 0x3f2   :  { %2771 = vmatmul.mubr.bf16.vlgmr.msra.gmra.mrb[24].mxu0 %v2047_v54 }
 0x3f3   :  { %2774 = vmatprep.mubr.bf16.mxu0 %v2048_v34 }
 0x3fa   :  { %2775 = vmatmul.mubr.bf16.gmra.mrb[28].mxu0 %v2049_v56  ;;  %v2654_v56 = vld [vmem:[%s3939_s12] ss:$0 sm:$0xff]  ;;  %s3337_s12 = smov [#allocation7]  }
 0x3fb   :  { %2778 = vmatprep.mubr.bf16.mxu0 %v2050_v44  ;;  %s2418_s21 = sshll.u32 %s3337_s12, 4  ;;  %s2419_s21 = int_to_ptr.vmem [resolvable:$true] %s2418_s21 }
 0x3fc   :  { %s3300_s11 = scalar_lea.vmem %s2419_s21, 2048  ;;  %p3305_p3 = scmp.lt.s32.totalorder %s2419_s21, %s2419_s21 }
 0x3fd   :  { %p3301_p2 = scmp.ne.s32.totalorder %s2419_s21, %s3300_s11  ;;  %p3306_p4 = scmp.lt.s32.totalorder %s3300_s11, %s3300_s11 }
 0x3ff   :  { %p3307_p5 = por %p3306_p4, %p3305_p3 }
 0x401   :  { %p3308_p6 = pnand %p3307_p5, %p3301_p2 }
 0x402   :  { %2779 = vmatmul.mubr.bf16.gmra.mrb[32].mxu0 %v2051_v55 }
 0x403   :  { %2782 = vmatprep.mubr.bf16.mxu0 %v2052_v36 }
 0x40a   :  { %2783 = vmatmul.mubr.bf16.gmra.mrb[36].mxu0 %v2053_v57 }
 0x4c5   :  { %v2772_v0 = vpop.f32.mrb[24].mxu0 }
 0x4c6   :  { %v2151_v2 = vadd.f32 %v2772_v0, %v2645_v63  ;;  %v2142_v3 = vpop.f32.mrb[25].mxu0 }
 0x4c7   :  { %v2143_v4 = vadd.f32 %v2645_v63, %v2142_v3  ;;  %v2773_v5 = vpop.f32.mrb[26].mxu0 }
 0x4c8   :  { %3224 = vtanh.f32 %v2151_v2  ;;  %v2154_v6 = vadd.f32 %v2773_v5, %v2645_v63  ;;  %v2145_v1 = vpop.f32.mrb[27].mxu0 }
 0x4c9   :  { %3226 = vtanh.f32 %v2143_v4  ;;  %v2146_v7 = vadd.f32 %v2645_v63, %v2145_v1 }
 0x4ca   :  { %3228 = vtanh.f32 %v2154_v6 }
 0x4cb   :  { %3230 = vtanh.f32 %v2146_v7 }
 0x4cd   :  { %v2776_v8 = vpop.f32.mrb[28].mxu0 }
 0x4ce   :  { %v2167_v9 = vadd.f32 %v2776_v8, %v2645_v63  ;;  %v2158_v10 = vpop.f32.mrb[29].mxu0 }
 0x4cf   :  { %v2159_v11 = vadd.f32 %v2645_v63, %v2158_v10  ;;  %v2777_v12 = vpop.f32.mrb[30].mxu0 }
 0x4d0   :  { %3232 = vtanh.f32 %v2167_v9  ;;  %v2170_v13 = vadd.f32 %v2777_v12, %v2645_v63  ;;  %v2161_v14 = vpop.f32.mrb[31].mxu0 }
 0x4d1   :  { %3234 = vtanh.f32 %v2159_v11  ;;  %v2162_v15 = vadd.f32 %v2645_v63, %v2161_v14 }
 0x4d2   :  { %v3225_v16 = vpop.eup %3224  ;;  %3236 = vtanh.f32 %v2170_v13 }
 0x4d3   :  { %v3227_v17 = vpop.eup %3226  ;;  %3238 = vtanh.f32 %v2162_v15 }
 0x4d4   :  { %v3229_v18 = vpop.eup %3228 }
 0x4d5   :  { %v3231_v19 = vpop.eup %3230  ;;  %v2780_v20 = vpop.f32.mrb[32].mxu0  ;;  %v2239_v21 = vpack.c.bf16 %v3229_v18, %v3225_v16 }
 0x4d6   :  { %v2183_v22 = vadd.f32 %v2780_v20, %v2645_v63  ;;  %v2174_v23 = vpop.f32.mrb[33].mxu0  ;;  %v2238_v24 = vpack.c.bf16 %v3231_v19, %v3227_v17 }
 0x4d7   :  { %v2175_v25 = vadd.f32 %v2645_v63, %v2174_v23  ;;  %v2781_v26 = vpop.f32.mrb[34].mxu0 }
 0x4d8   :  { %3240 = vtanh.f32 %v2183_v22  ;;  %v2186_v27 = vadd.f32 %v2781_v26, %v2645_v63  ;;  %v2177_v28 = vpop.f32.mrb[35].mxu0  ;;  %2802 = vmatprep.mubr.bf16.mxu1 %v2238_v24 }
 0x4d9   :  { %3242 = vtanh.f32 %v2175_v25  ;;  %v2178_v29 = vadd.f32 %v2645_v63, %v2177_v28  ;;  %2803 = vmatmul.mubr.bf16.vlgmr.msra.gmra.mrb[20].mxu1 %v2239_v21 }
 0x4da   :  { %v3233_v32 = vpop.eup %3232  ;;  %3244 = vtanh.f32 %v2186_v27 }
 0x4db   :  { %v3235_v38 = vpop.eup %3234  ;;  %3246 = vtanh.f32 %v2178_v29 }
 0x4dc   :  { %v3237_v30 = vpop.eup %3236 }
 0x4dd   :  { %v3239_v33 = vpop.eup %3238  ;;  %v2784_v31 = vpop.f32.mrb[36].mxu0  ;;  %v2241_v44 = vpack.c.bf16 %v3237_v30, %v3233_v32 }
 0x4de   :  { %v2199_v34 = vadd.f32 %v2784_v31, %v2645_v63  ;;  %v2190_v36 = vpop.f32.mrb[37].mxu0  ;;  %v2240_v35 = vpack.c.bf16 %v3239_v33, %v3235_v38 }
 0x4df   :  { %v2191_v37 = vadd.f32 %v2645_v63, %v2190_v36  ;;  %v2785_v39 = vpop.f32.mrb[38].mxu0 }
 0x4e0   :  { %3248 = vtanh.f32 %v2199_v34  ;;  %v2202_v40 = vadd.f32 %v2785_v39, %v2645_v63  ;;  %v2193_v41 = vpop.f32.mrb[39].mxu0  ;;  %2806 = vmatprep.mubr.bf16.mxu1 %v2240_v35 }
 0x4e1   :  { %3250 = vtanh.f32 %v2191_v37  ;;  %v2194_v42 = vadd.f32 %v2645_v63, %v2193_v41  ;;  %2807 = vmatmul.mubr.bf16.gmra.mrb[24].mxu1 %v2241_v44 }
 0x4e2   :  { %v3241_v43 = vpop.eup %3240  ;;  %3252 = vtanh.f32 %v2202_v40 }
 0x4e3   :  { %v3243_v45 = vpop.eup %3242  ;;  %3254 = vtanh.f32 %v2194_v42 }
 0x4e4   :  { %v3245_v46 = vpop.eup %3244 }
 0x4e5   :  { %v3247_v47 = vpop.eup %3246  ;;  %v2243_v48 = vpack.c.bf16 %v3245_v46, %v3241_v43 }
 0x4e6   :  { %v2242_v49 = vpack.c.bf16 %v3247_v47, %v3243_v45 }
 0x4e8   :  { %2810 = vmatprep.mubr.bf16.mxu1 %v2242_v49 }
 0x4e9   :  { %2811 = vmatmul.mubr.bf16.gmra.mrb[28].mxu1 %v2243_v48 }
 0x4ea   :  { %v3249_v50 = vpop.eup %3248 }
 0x4eb   :  { %v3251_v51 = vpop.eup %3250 }
 0x4ec   :  { %v3253_v52 = vpop.eup %3252 }
 0x4ed   :  { %v3255_v53 = vpop.eup %3254  ;;  %v2245_v54 = vpack.c.bf16 %v3253_v52, %v3249_v50 }
 0x4ee   :  { %v2244_v55 = vpack.c.bf16 %v3255_v53, %v3251_v51 }
 0x4f0   :  { %2814 = vmatprep.mubr.bf16.mxu1 %v2244_v55 }
 0x4f1   :  { %2815 = vmatmul.mubr.bf16.gmra.mrb[32].mxu1 %v2245_v54 }
 0x5ac   :  { %v2804_v57 = vpop.f32.mrb[20].mxu1 }
 0x5ad   :  { %v2343_v58 = vadd.f32 %v2804_v57, %v2654_v56  ;;  %v2334_v59 = vpop.f32.mrb[21].mxu1 }
 0x5ae   :  { %v2335_v60 = vadd.f32 %v2654_v56, %v2334_v59  ;;  %v2805_v61 = vpop.f32.mrb[22].mxu1 }
 0x5af   :  { %2399 = vst [vmem:[#allocation7 + $0x10] sm:$0xff] %v2343_v58  ;;  %v2346_v62 = vadd.f32 %v2805_v61, %v2654_v56  ;;  %v2337_v63 = vpop.f32.mrb[23].mxu1 }
 0x5b0   :  { %2397 = vst [vmem:[#allocation7] sm:$0xff] %v2335_v60  ;;  %v2338_v0 = vadd.f32 %v2654_v56, %v2337_v63 }
 0x5b1   :  { %2400 = vst [vmem:[#allocation7 + $0x18] sm:$0xff] %v2346_v62 }
 0x5b2   :  { %2398 = vst [vmem:[#allocation7 + $0x8] sm:$0xff] %v2338_v0 }
 0x5b4   :  { %v2808_v2 = vpop.f32.mrb[24].mxu1 }
 0x5b5   :  { %v2359_v3 = vadd.f32 %v2808_v2, %v2654_v56  ;;  %v2350_v4 = vpop.f32.mrb[25].mxu1 }
 0x5b6   :  { %v2351_v5 = vadd.f32 %v2654_v56, %v2350_v4  ;;  %v2809_v6 = vpop.f32.mrb[26].mxu1 }
 0x5b7   :  { %2403 = vst [vmem:[#allocation7 + $0x30] sm:$0xff] %v2359_v3  ;;  %v2362_v1 = vadd.f32 %v2809_v6, %v2654_v56  ;;  %v2353_v7 = vpop.f32.mrb[27].mxu1 }
 0x5b8   :  { %2401 = vst [vmem:[#allocation7 + $0x20] sm:$0xff] %v2351_v5  ;;  %v2354_v8 = vadd.f32 %v2654_v56, %v2353_v7 }
 0x5b9   :  { %2404 = vst [vmem:[#allocation7 + $0x38] sm:$0xff] %v2362_v1 }
 0x5ba   :  { %2402 = vst [vmem:[#allocation7 + $0x28] sm:$0xff] %v2354_v8 }
 0x5bc   :  { %v2812_v9 = vpop.f32.mrb[28].mxu1 }
 0x5bd   :  { %v2375_v10 = vadd.f32 %v2812_v9, %v2654_v56  ;;  %v2366_v11 = vpop.f32.mrb[29].mxu1 }
 0x5be   :  { %v2367_v12 = vadd.f32 %v2654_v56, %v2366_v11  ;;  %v2813_v13 = vpop.f32.mrb[30].mxu1 }
 0x5bf   :  { %2407 = vst [vmem:[#allocation7 + $0x50] sm:$0xff] %v2375_v10  ;;  %v2378_v14 = vadd.f32 %v2813_v13, %v2654_v56  ;;  %v2369_v15 = vpop.f32.mrb[31].mxu1 }
 0x5c0   :  { %2405 = vst [vmem:[#allocation7 + $0x40] sm:$0xff] %v2367_v12  ;;  %v2370_v16 = vadd.f32 %v2654_v56, %v2369_v15 }
 0x5c1   :  { %2408 = vst [vmem:[#allocation7 + $0x58] sm:$0xff] %v2378_v14 }
 0x5c2   :  { %2406 = vst [vmem:[#allocation7 + $0x48] sm:$0xff] %v2370_v16 }
 0x5c4   :  { %v2816_v17 = vpop.f32.mrb[32].mxu1 }
 0x5c5   :  { %v2391_v18 = vadd.f32 %v2816_v17, %v2654_v56  ;;  %v2382_v19 = vpop.f32.mrb[33].mxu1 }
 0x5c6   :  { %v2383_v20 = vadd.f32 %v2654_v56, %v2382_v19  ;;  %v2817_v21 = vpop.f32.mrb[34].mxu1 }
 0x5c7   :  { %2411 = vst [vmem:[#allocation7 + $0x70] sm:$0xff] %v2391_v18  ;;  %v2394_v22 = vadd.f32 %v2817_v21, %v2654_v56  ;;  %v2385_v23 = vpop.f32.mrb[35].mxu1 }
 0x5c8   :  { %2409 = vst [vmem:[#allocation7 + $0x60] sm:$0xff] %v2383_v20  ;;  %v2386_v24 = vadd.f32 %v2654_v56, %v2385_v23 }
 0x5c9   :  { %2412 = vst [vmem:[#allocation7 + $0x78] sm:$0xff] %v2394_v22 }
 0x5ca   :  { %2410 = vst [vmem:[#allocation7 + $0x68] sm:$0xff] %v2386_v24 }
 0x5cb   :  { %3311 = shalt.err (!%p3308_p6)
}
 0x5cc   :  { %s3312_s24 = scalar_lea.hbm %s3940_s13, 2048 }
 0x5cd   :  { %p3313_p7 = scmp.ne.s32.totalorder %s3940_s13, %s3312_s24  ;;  %p3316_p8 = scmp.lt.u32.totalorder %s3312_s24, %s3940_s13 }
 0x5cf   :  { %p3318_p9 = pnand %p3316_p8, %p3313_p7 }
 0x5d1   :  { %3321 = shalt.err (!%p3318_p9)
}
 0x5d2   :  { %s3338_s27 = smov 128   ;;  %s3339_s3 = smov 8  }
 0x5d3   :  { %2424 = dma.vmem_to_hbm [thread:$0]  %s2419_s21, 2048, %s3940_s13, [#allocation4], %s3338_s27, %s3338_s27, %s3339_s3  }
 0x5d4   :  { %3326 = dma.done.wait [#allocation4], 2048  }
 0x5d5   :  { %3327 = vsyncadd [#allocation4], 4294965248 }
 0x5d6   :  { %2428 = vsyncpa [#allocation3], 1 }
 0x5d7   :  { %2429 = vsyncpa [#allocation6], 1 }
 0x5d8   :  { %2430 = vsyncpa [#allocation4], 1 }

</bundles_post_ra>
